<compile_context>
chip_gen: v6e
topology: v6e:2x2x1
jax: 0.10.0
libtpu: 0.0.40
codegen_flags: <defaults>
</compile_context>

<pallas_src>
import numpy as np
import jax
import jax.numpy as jnp
from jax.experimental import pallas as pl
from jax.experimental.pallas import tpu as pltpu

# ---- module hyperparameters (consistent with the PyTorch module) ----
B = 2
C = 16                        # inp
NUM_HEADS = 2
KEY_DIM = 16
VALUE_DIM = 16                # note: the reference forward never uses value_dim
H = W = 8                     # forward requires square spatial
HW = H * W                    # 64
BHW = B * HW                  # 128 : batch folded into the lane axis
NHKD = NUM_HEADS * KEY_DIM    # 32
HEAD_DIM = KEY_DIM // NUM_HEADS
QKV = NHKD + 2 * KEY_DIM      # 64 stacked q/k/v output channels
GROUPS = HW // KEY_DIM        # 4 lane groups created by the torch .view
CP1 = C + 1                   # x channels + ones row (bias folded into the matmul)
WO_COL = 32                   # lane offset of the output-proj weight in the packed slab
WSLAB = WO_COL + NHKD         # 64 packed-weight lanes: [wqkv_aug | pad | wo]
LAYER_SCALE_INIT = 1e-5
BN_EPS = 1e-5


# ---------------- fused kernel ----------------
def _make_kernel(emit_branch):
    def kernel(x_ref, w_ref, out_ref, *rest):
        if emit_branch:
            branch_ref, ctx_scr = rest
        else:
            (ctx_scr,) = rest

        xs = x_ref[...]                              # (C+1, 2*BHW) f32
        x = xs[:C, :BHW]                             # (16, 128) raw input: shortcut/residual
        w = w_ref[...]                               # (QKV, WSLAB)
        wqkv = w[:, :CP1]                            # (64, 17): BN + 1/sqrt(hd) + bias folded
        wo = w[:C, WO_COL:WO_COL + NHKD]             # (16, 32)

        # One fused q/k/v projection for BOTH batches at 256-lane width.
        #   lanes [0:128)   : original spatial order     -> used for q and v
        #   lanes [128:256) : tau-permuted spatial order  -> k already in score-column order
        qkv = jnp.dot(wqkv, xs, preferred_element_type=jnp.float32)      # (64, 256)
        q_all = qkv[:NHKD, :BHW]                     # (32, 128)  q (batch in lanes)
        k_all = qkv[NHKD:NHKD + KEY_DIM, BHW:]       # (16, 128)  k, permuted columns
        v_all = qkv[NHKD + KEY_DIM:, :BHW]           # (16, 128)  v (batch in lanes)

        for b in range(B):                           # unrolled; batches are independent
            qb = q_all[:, b * HW:(b + 1) * HW]       # (32, 64)
            kb = k_all[:, b * HW:(b + 1) * HW]       # (16, 64)
            vb = v_all[:, b * HW:(b + 1) * HW]       # (16, 64)

            # torch .view row mixing == stack the 4 spatial lane-groups along sublanes
            q_s = jnp.concatenate(
                [qb[:, g * KEY_DIM:(g + 1) * KEY_DIM] for g in range(GROUPS)],
                axis=0)                              # (NUM_HEADS*HW, KEY_DIM) = (128, 16)
            v_s = jnp.concatenate(
                [vb[:, g * KEY_DIM:(g + 1) * KEY_DIM] for g in range(GROUPS)],
                axis=0)                              # (HW, KEY_DIM) = (64, 16)

            # multi-query attention: K/V shared across heads -> ONE scores matmul and
            # ONE context matmul for all num_heads*HW = 128 query rows of this batch.
            s = jnp.dot(q_s, kb, preferred_element_type=jnp.float32)     # (128, 64)
            m = jnp.max(s, axis=-1, keepdims=True)
            e = jnp.exp(s - m)
            p = e / jnp.sum(e, axis=-1, keepdims=True)
            ctx = jnp.dot(p, v_s, preferred_element_type=jnp.float32)    # (128, 16)

            # context.view(B, nh*kd, px, px): scatter the 4 row blocks back to their
            # lane groups with slice-stores into VMEM scratch (no MXU, no lane concat).
            for g in range(GROUPS):
                ctx_scr[:, b * HW + g * KEY_DIM:b * HW + (g + 1) * KEY_DIM] = (
                    ctx[g * NHKD:(g + 1) * NHKD, :])

        # output projection at full 128-lane width + LayerScale (gamma == init_value
        # everywhere) + residual; single lane-dense (16, 128) store.
        branch = jnp.dot(wo, ctx_scr[...], preferred_element_type=jnp.float32)  # (16, 128)
        out_ref[...] = branch * LAYER_SCALE_INIT + x
        if emit_branch:
            branch_ref[...] = branch

    return kernel


# ---------------- wrapper ----------------
def mhsa_block_forward(x, params, *, return_branch=False):
    """x: (B, C, H, W) float32 (NCHW, like PyTorch). Returns (B, C, H, W)."""
    f32 = jnp.float32

    # Fold BatchNorm (inference running stats), 1/sqrt(head_dim) and the BN shift into
    # a single augmented projection weight (bias column + ones row trick).
    scale = params["bn_gamma"] / jnp.sqrt(params["bn_var"] + BN_EPS)              # (C,)
    shift = params["bn_beta"] - params["bn_mean"] * scale                         # (C,)
    inv_sqrt_hd = 1.0 / (HEAD_DIM ** 0.5)
    w_stack = jnp.concatenate(
        [params["wq"] * inv_sqrt_hd, params["wk"], params["wv"]], axis=0)         # (QKV, C)
    wqkv_aug = jnp.concatenate(
        [w_stack * scale[None, :], (w_stack @ shift)[:, None]], axis=1)           # (QKV, C+1)
    wo_pad = jnp.zeros((QKV, NHKD), f32).at[:C, :].set(params["wo"])
    gap = jnp.zeros((QKV, WO_COL - CP1), f32)
    w_slab = jnp.concatenate([wqkv_aug, gap, wo_pad], axis=1)                     # (QKV, 64)

    # Fold batch into the lane axis; append (a) a tau-permuted copy of x so the kernel's
    # K comes out of the projection already in score-column order, and (b) a ones row
    # (bias).  Pure XLA layout plumbing outside the kernel.
    x_cb = jnp.transpose(x.reshape(B, C, HW), (1, 0, 2))                          # (C, B, HW)
    x_flat = x_cb.reshape(C, BHW)
    # tau(r) = (r % KEY_DIM) * GROUPS + r // KEY_DIM  <=>  transpose of (KEY_DIM, GROUPS)
    x_perm = jnp.transpose(
        x_cb.reshape(C, B, KEY_DIM, GROUPS), (0, 1, 3, 2)).reshape(C, BHW)
    x_slab = jnp.concatenate(
        [jnp.concatenate([x_flat, x_perm], axis=1),
         jnp.ones((1, 2 * BHW), f32)], axis=0)                                    # (C+1, 256)

    if return_branch:
        out_shape = (jax.ShapeDtypeStruct((C, BHW), f32),
                     jax.ShapeDtypeStruct((C, BHW), f32))
        out_specs = (pl.BlockSpec((C, BHW), lambda: (0, 0)),
                     pl.BlockSpec((C, BHW), lambda: (0, 0)))
    else:
        out_shape = jax.ShapeDtypeStruct((C, BHW), f32)
        out_specs = pl.BlockSpec((C, BHW), lambda: (0, 0))

    results = pl.pallas_call(
        _make_kernel(return_branch),
        out_shape=out_shape,
        in_specs=[
            pl.BlockSpec((CP1, 2 * BHW), lambda: (0, 0)),
            pl.BlockSpec((QKV, WSLAB), lambda: (0, 0)),
        ],
        out_specs=out_specs,
        scratch_shapes=[pltpu.VMEM((NHKD, BHW), f32)],
    )(x_slab, w_slab)

    def to_nchw(flat):          # (C, B*HW) -> (B, C, H, W)
        return jnp.transpose(flat.reshape(C, B, H, W), (1, 0, 2, 3))

    if return_branch:
        out_flat, branch_flat = results
        return to_nchw(out_flat), to_nchw(branch_flat)
    return to_nchw(results)


# ---------------- deterministic parameter init ----------------
def init_params(key):
    ks = jax.random.split(key, 8)
    p = {}
    p["bn_gamma"] = 1.0 + 0.1 * jax.random.normal(ks[0], (C,), jnp.float32)
    p["bn_beta"] = 0.1 * jax.random.normal(ks[1], (C,), jnp.float32)
    p["bn_mean"] = 0.1 * jax.random.normal(ks[2], (C,), jnp.float32)
    p["bn_var"] = 1.0 + 0.1 * jnp.abs(jax.random.normal(ks[3], (C,), jnp.float32))
    p["wq"] = 0.1 * jax.random.normal(ks[4], (NHKD, C), jnp.float32)      # _query_proj 1x1 conv
    p["wk"] = 0.1 * jax.random.normal(ks[5], (KEY_DIM, C), jnp.float32)   # _key_proj 1x1 conv
    p["wv"] = 0.1 * jax.random.normal(ks[6], (KEY_DIM, C), jnp.float32)   # _value_proj 1x1 conv
    p["wo"] = 0.1 * jax.random.normal(ks[7], (C, NHKD), jnp.float32)      # _output_proj 1x1 conv
    return p


# ---------------- pure-JAX reference (mirrors the PyTorch forward) ----------------
def reference_forward(x, p):
    """Returns (block output, pre-LayerScale / pre-residual attention branch)."""
    with jax.default_matmul_precision("float32"):
        shortcut = x
        scale = p["bn_gamma"] / jnp.sqrt(p["bn_var"] + BN_EPS)
        xn = (x - p["bn_mean"][None, :, None, None]) * scale[None, :, None, None] \
             + p["bn_beta"][None, :, None, None]
        q = jnp.einsum('oc,bchw->bohw', p["wq"], xn)
        k = jnp.einsum('oc,bchw->bohw', p["wk"], xn)
        v = jnp.einsum('oc,bchw->bohw', p["wv"], xn)
        q = q.reshape(B, NUM_HEADS, -1, KEY_DIM)      # torch .view semantics (row-major)
        k = k.reshape(B, KEY_DIM, -1)
        v = v.reshape(B, -1, KEY_DIM)
        attn = jnp.einsum('bnqd,bdk->bnqk', q, k) / (HEAD_DIM ** 0.5)
        attn = jax.nn.softmax(attn, axis=-1)
        ctx = jnp.einsum('bnqk,bkd->bnqd', attn, v)
        ctx = ctx.reshape(B, NHKD, H, W)
        branch = jnp.einsum('oc,bchw->bohw', p["wo"], ctx)   # _output_proj
        out = branch * LAYER_SCALE_INIT + shortcut           # LayerScale + residual
    return out, branch


if __name__ == "__main__":
    key = jax.random.PRNGKey(0)
    kx, kparams = jax.random.split(key)
    x = jax.random.normal(kx, (B, C, H, W), jnp.float32)
    params = init_params(kparams)

    fwd = jax.jit(mhsa_block_forward, static_argnames=("return_branch",))
    out = jax.block_until_ready(fwd(x, params))                           # production path
    out_dbg, branch = jax.block_until_ready(fwd(x, params, return_branch=True))

    ref_out, ref_branch = reference_forward(x, params)

    # (1) attention branch (pre-LayerScale, pre-residual): this is where softmax /
    #     context / .view bookkeeping errors would show up.  Tolerance covers the TPU
    #     default (bf16-pass) f32 matmul precision; real structural bugs produce
    #     O(0.1-1) absolute errors and are caught.
    np.testing.assert_allclose(np.asarray(branch), np.asarray(ref_branch),
                               rtol=2e-2, atol=2e-3)
    # (2) full block output (residual-dominated): tight tolerance.
    np.testing.assert_allclose(np.asarray(out), np.asarray(ref_out), rtol=1e-5, atol=1e-6)
    np.testing.assert_allclose(np.asarray(out_dbg), np.asarray(ref_out), rtol=1e-5, atol=1e-6)
    print("KERNEL_OK")
</pallas_src>

<mosaic_0001>
module attributes {stable_mosaic.version = 11 : i64} {
  func.func @kernel(%arg0: memref<17x256xf32, #tpu.memory_space<vmem>>, %arg1: memref<64x64xf32, #tpu.memory_space<vmem>>, %arg2: memref<16x128xf32, #tpu.memory_space<vmem>>, %arg3: memref<32x128xf32, #tpu.memory_space<vmem>>) attributes {dimension_semantics = [], scalar_prefetch = 0 : i64, scratch_operands = 1 : i64, tpu.core_type = #tpu.core_type<tc>} {
    %c0 = arith.constant 0 : index
    %c0_0 = arith.constant 0 : index
    %0 = vector.load %arg0[%c0, %c0_0] : memref<17x256xf32, #tpu.memory_space<vmem>>, vector<17x256xf32>
    %1 = vector.extract_strided_slice %0 {offsets = [0, 0], sizes = [16, 128], strides = [1, 1]} : vector<17x256xf32> to vector<16x128xf32>
    %c0_1 = arith.constant 0 : index
    %c0_2 = arith.constant 0 : index
    %2 = vector.load %arg1[%c0_1, %c0_2] : memref<64x64xf32, #tpu.memory_space<vmem>>, vector<64x64xf32>
    %3 = vector.extract_strided_slice %2 {offsets = [0, 0], sizes = [64, 17], strides = [1, 1]} : vector<64x64xf32> to vector<64x17xf32>
    %4 = vector.extract_strided_slice %2 {offsets = [0, 32], sizes = [16, 32], strides = [1, 1]} : vector<64x64xf32> to vector<16x32xf32>
    %cst = arith.constant dense<0.000000e+00> : vector<64x256xf32>
    %5 = tpu.matmul %3, %0, %cst {dimension_numbers = #tpu.dot_dimension_numbers<[1], [0], [0], [1], [0, 0, 1, 1], [], []>} : vector<64x17xf32>, vector<17x256xf32>, vector<64x256xf32> -> vector<64x256xf32>
    %6 = vector.extract_strided_slice %5 {offsets = [0, 0], sizes = [32, 128], strides = [1, 1]} : vector<64x256xf32> to vector<32x128xf32>
    %7 = vector.extract_strided_slice %5 {offsets = [32, 128], sizes = [16, 128], strides = [1, 1]} : vector<64x256xf32> to vector<16x128xf32>
    %8 = vector.extract_strided_slice %5 {offsets = [48, 0], sizes = [16, 128], strides = [1, 1]} : vector<64x256xf32> to vector<16x128xf32>
    %9 = vector.extract_strided_slice %6 {offsets = [0, 0], sizes = [32, 64], strides = [1, 1]} : vector<32x128xf32> to vector<32x64xf32>
    %10 = vector.extract_strided_slice %7 {offsets = [0, 0], sizes = [16, 64], strides = [1, 1]} : vector<16x128xf32> to vector<16x64xf32>
    %11 = vector.extract_strided_slice %8 {offsets = [0, 0], sizes = [16, 64], strides = [1, 1]} : vector<16x128xf32> to vector<16x64xf32>
    %12 = vector.extract_strided_slice %9 {offsets = [0, 0], sizes = [32, 16], strides = [1, 1]} : vector<32x64xf32> to vector<32x16xf32>
    %13 = vector.extract_strided_slice %9 {offsets = [0, 16], sizes = [32, 16], strides = [1, 1]} : vector<32x64xf32> to vector<32x16xf32>
    %14 = vector.extract_strided_slice %9 {offsets = [0, 32], sizes = [32, 16], strides = [1, 1]} : vector<32x64xf32> to vector<32x16xf32>
    %15 = vector.extract_strided_slice %9 {offsets = [0, 48], sizes = [32, 16], strides = [1, 1]} : vector<32x64xf32> to vector<32x16xf32>
    %16 = tpu.concatenate %12, %13, %14, %15 in 0 : vector<32x16xf32>, vector<32x16xf32>, vector<32x16xf32>, vector<32x16xf32> -> vector<128x16xf32>
    %17 = vector.extract_strided_slice %11 {offsets = [0, 0], sizes = [16, 16], strides = [1, 1]} : vector<16x64xf32> to vector<16x16xf32>
    %18 = vector.extract_strided_slice %11 {offsets = [0, 16], sizes = [16, 16], strides = [1, 1]} : vector<16x64xf32> to vector<16x16xf32>
    %19 = vector.extract_strided_slice %11 {offsets = [0, 32], sizes = [16, 16], strides = [1, 1]} : vector<16x64xf32> to vector<16x16xf32>
    %20 = vector.extract_strided_slice %11 {offsets = [0, 48], sizes = [16, 16], strides = [1, 1]} : vector<16x64xf32> to vector<16x16xf32>
    %21 = tpu.concatenate %17, %18, %19, %20 in 0 : vector<16x16xf32>, vector<16x16xf32>, vector<16x16xf32>, vector<16x16xf32> -> vector<64x16xf32>
    %cst_3 = arith.constant dense<0.000000e+00> : vector<128x64xf32>
    %22 = tpu.matmul %16, %10, %cst_3 {dimension_numbers = #tpu.dot_dimension_numbers<[1], [0], [0], [1], [0, 0, 1, 1], [], []>} : vector<128x16xf32>, vector<16x64xf32>, vector<128x64xf32> -> vector<128x64xf32>
    %cst_4 = arith.constant dense<0xFF800000> : vector<128xf32>
    %23 = vector.multi_reduction <maximumf>, %22, %cst_4 [1] : vector<128x64xf32> to vector<128xf32>
    %24 = vector.shape_cast %23 : vector<128xf32> to vector<128x1xf32>
    %25 = vector.broadcast %24 : vector<128x1xf32> to vector<128x64xf32>
    %26 = arith.subf %22, %25 : vector<128x64xf32>
    %27 = math.exp %26 : vector<128x64xf32>
    %cst_5 = arith.constant dense<0.000000e+00> : vector<128xf32>
    %28 = vector.multi_reduction <add>, %27, %cst_5 [1] : vector<128x64xf32> to vector<128xf32>
    %29 = vector.shape_cast %28 : vector<128xf32> to vector<128x1xf32>
    %30 = vector.broadcast %29 : vector<128x1xf32> to vector<128x64xf32>
    %31 = arith.divf %27, %30 : vector<128x64xf32>
    %cst_6 = arith.constant dense<0.000000e+00> : vector<128x16xf32>
    %32 = tpu.matmul %31, %21, %cst_6 {dimension_numbers = #tpu.dot_dimension_numbers<[1], [0], [0], [1], [0, 0, 1, 1], [], []>} : vector<128x64xf32>, vector<64x16xf32>, vector<128x16xf32> -> vector<128x16xf32>
    %33 = vector.extract_strided_slice %32 {offsets = [0, 0], sizes = [32, 16], strides = [1, 1]} : vector<128x16xf32> to vector<32x16xf32>
    %c0_7 = arith.constant 0 : index
    %c0_8 = arith.constant 0 : index
    %34 = vector.load %arg3[%c0_7, %c0_8] : memref<32x128xf32, #tpu.memory_space<vmem>>, vector<32x16xf32>
    tpu.vector_store %arg3[%c0_7, %c0_8], %33 {strides = array<i32>} : memref<32x128xf32, #tpu.memory_space<vmem>>, vector<32x16xf32>,
    %35 = vector.extract_strided_slice %32 {offsets = [32, 0], sizes = [32, 16], strides = [1, 1]} : vector<128x16xf32> to vector<32x16xf32>
    %c0_9 = arith.constant 0 : index
    %c16 = arith.constant 16 : index
    %36 = vector.load %arg3[%c0_9, %c16] : memref<32x128xf32, #tpu.memory_space<vmem>>, vector<32x16xf32>
    tpu.vector_store %arg3[%c0_9, %c16], %35 {strides = array<i32>} : memref<32x128xf32, #tpu.memory_space<vmem>>, vector<32x16xf32>,
    %37 = vector.extract_strided_slice %32 {offsets = [64, 0], sizes = [32, 16], strides = [1, 1]} : vector<128x16xf32> to vector<32x16xf32>
    %c0_10 = arith.constant 0 : index
    %c32 = arith.constant 32 : index
    %38 = vector.load %arg3[%c0_10, %c32] : memref<32x128xf32, #tpu.memory_space<vmem>>, vector<32x16xf32>
    tpu.vector_store %arg3[%c0_10, %c32], %37 {strides = array<i32>} : memref<32x128xf32, #tpu.memory_space<vmem>>, vector<32x16xf32>,
    %39 = vector.extract_strided_slice %32 {offsets = [96, 0], sizes = [32, 16], strides = [1, 1]} : vector<128x16xf32> to vector<32x16xf32>
    %c0_11 = arith.constant 0 : index
    %c48 = arith.constant 48 : index
    %40 = vector.load %arg3[%c0_11, %c48] : memref<32x128xf32, #tpu.memory_space<vmem>>, vector<32x16xf32>
    tpu.vector_store %arg3[%c0_11, %c48], %39 {strides = array<i32>} : memref<32x128xf32, #tpu.memory_space<vmem>>, vector<32x16xf32>,
    %41 = vector.extract_strided_slice %6 {offsets = [0, 64], sizes = [32, 64], strides = [1, 1]} : vector<32x128xf32> to vector<32x64xf32>
    %42 = vector.extract_strided_slice %7 {offsets = [0, 64], sizes = [16, 64], strides = [1, 1]} : vector<16x128xf32> to vector<16x64xf32>
    %43 = vector.extract_strided_slice %8 {offsets = [0, 64], sizes = [16, 64], strides = [1, 1]} : vector<16x128xf32> to vector<16x64xf32>
    %44 = vector.extract_strided_slice %41 {offsets = [0, 0], sizes = [32, 16], strides = [1, 1]} : vector<32x64xf32> to vector<32x16xf32>
    %45 = vector.extract_strided_slice %41 {offsets = [0, 16], sizes = [32, 16], strides = [1, 1]} : vector<32x64xf32> to vector<32x16xf32>
    %46 = vector.extract_strided_slice %41 {offsets = [0, 32], sizes = [32, 16], strides = [1, 1]} : vector<32x64xf32> to vector<32x16xf32>
    %47 = vector.extract_strided_slice %41 {offsets = [0, 48], sizes = [32, 16], strides = [1, 1]} : vector<32x64xf32> to vector<32x16xf32>
    %48 = tpu.concatenate %44, %45, %46, %47 in 0 : vector<32x16xf32>, vector<32x16xf32>, vector<32x16xf32>, vector<32x16xf32> -> vector<128x16xf32>
    %49 = vector.extract_strided_slice %43 {offsets = [0, 0], sizes = [16, 16], strides = [1, 1]} : vector<16x64xf32> to vector<16x16xf32>
    %50 = vector.extract_strided_slice %43 {offsets = [0, 16], sizes = [16, 16], strides = [1, 1]} : vector<16x64xf32> to vector<16x16xf32>
    %51 = vector.extract_strided_slice %43 {offsets = [0, 32], sizes = [16, 16], strides = [1, 1]} : vector<16x64xf32> to vector<16x16xf32>
    %52 = vector.extract_strided_slice %43 {offsets = [0, 48], sizes = [16, 16], strides = [1, 1]} : vector<16x64xf32> to vector<16x16xf32>
    %53 = tpu.concatenate %49, %50, %51, %52 in 0 : vector<16x16xf32>, vector<16x16xf32>, vector<16x16xf32>, vector<16x16xf32> -> vector<64x16xf32>
    %cst_12 = arith.constant dense<0.000000e+00> : vector<128x64xf32>
    %54 = tpu.matmul %48, %42, %cst_12 {dimension_numbers = #tpu.dot_dimension_numbers<[1], [0], [0], [1], [0, 0, 1, 1], [], []>} : vector<128x16xf32>, vector<16x64xf32>, vector<128x64xf32> -> vector<128x64xf32>
    %cst_13 = arith.constant dense<0xFF800000> : vector<128xf32>
    %55 = vector.multi_reduction <maximumf>, %54, %cst_13 [1] : vector<128x64xf32> to vector<128xf32>
    %56 = vector.shape_cast %55 : vector<128xf32> to vector<128x1xf32>
    %57 = vector.broadcast %56 : vector<128x1xf32> to vector<128x64xf32>
    %58 = arith.subf %54, %57 : vector<128x64xf32>
    %59 = math.exp %58 : vector<128x64xf32>
    %cst_14 = arith.constant dense<0.000000e+00> : vector<128xf32>
    %60 = vector.multi_reduction <add>, %59, %cst_14 [1] : vector<128x64xf32> to vector<128xf32>
    %61 = vector.shape_cast %60 : vector<128xf32> to vector<128x1xf32>
    %62 = vector.broadcast %61 : vector<128x1xf32> to vector<128x64xf32>
    %63 = arith.divf %59, %62 : vector<128x64xf32>
    %cst_15 = arith.constant dense<0.000000e+00> : vector<128x16xf32>
    %64 = tpu.matmul %63, %53, %cst_15 {dimension_numbers = #tpu.dot_dimension_numbers<[1], [0], [0], [1], [0, 0, 1, 1], [], []>} : vector<128x64xf32>, vector<64x16xf32>, vector<128x16xf32> -> vector<128x16xf32>
    %65 = vector.extract_strided_slice %64 {offsets = [0, 0], sizes = [32, 16], strides = [1, 1]} : vector<128x16xf32> to vector<32x16xf32>
    %c0_16 = arith.constant 0 : index
    %c64 = arith.constant 64 : index
    %66 = vector.load %arg3[%c0_16, %c64] : memref<32x128xf32, #tpu.memory_space<vmem>>, vector<32x16xf32>
    tpu.vector_store %arg3[%c0_16, %c64], %65 {strides = array<i32>} : memref<32x128xf32, #tpu.memory_space<vmem>>, vector<32x16xf32>,
    %67 = vector.extract_strided_slice %64 {offsets = [32, 0], sizes = [32, 16], strides = [1, 1]} : vector<128x16xf32> to vector<32x16xf32>
    %c0_17 = arith.constant 0 : index
    %c80 = arith.constant 80 : index
    %68 = vector.load %arg3[%c0_17, %c80] : memref<32x128xf32, #tpu.memory_space<vmem>>, vector<32x16xf32>
    tpu.vector_store %arg3[%c0_17, %c80], %67 {strides = array<i32>} : memref<32x128xf32, #tpu.memory_space<vmem>>, vector<32x16xf32>,
    %69 = vector.extract_strided_slice %64 {offsets = [64, 0], sizes = [32, 16], strides = [1, 1]} : vector<128x16xf32> to vector<32x16xf32>
    %c0_18 = arith.constant 0 : index
    %c96 = arith.constant 96 : index
    %70 = vector.load %arg3[%c0_18, %c96] : memref<32x128xf32, #tpu.memory_space<vmem>>, vector<32x16xf32>
    tpu.vector_store %arg3[%c0_18, %c96], %69 {strides = array<i32>} : memref<32x128xf32, #tpu.memory_space<vmem>>, vector<32x16xf32>,
    %71 = vector.extract_strided_slice %64 {offsets = [96, 0], sizes = [32, 16], strides = [1, 1]} : vector<128x16xf32> to vector<32x16xf32>
    %c0_19 = arith.constant 0 : index
    %c112 = arith.constant 112 : index
    %72 = vector.load %arg3[%c0_19, %c112] : memref<32x128xf32, #tpu.memory_space<vmem>>, vector<32x16xf32>
    tpu.vector_store %arg3[%c0_19, %c112], %71 {strides = array<i32>} : memref<32x128xf32, #tpu.memory_space<vmem>>, vector<32x16xf32>,
    %c0_20 = arith.constant 0 : index
    %c0_21 = arith.constant 0 : index
    %73 = vector.load %arg3[%c0_20, %c0_21] : memref<32x128xf32, #tpu.memory_space<vmem>>, vector<32x128xf32>
    %cst_22 = arith.constant dense<0.000000e+00> : vector<16x128xf32>
    %74 = tpu.matmul %4, %73, %cst_22 {dimension_numbers = #tpu.dot_dimension_numbers<[1], [0], [0], [1], [0, 0, 1, 1], [], []>} : vector<16x32xf32>, vector<32x128xf32>, vector<16x128xf32> -> vector<16x128xf32>
    %cst_23 = arith.constant 9.99999974E-6 : f32
    %75 = vector.broadcast %cst_23 : f32 to vector<16x128xf32>
    %76 = arith.mulf %74, %75 : vector<16x128xf32>
    %77 = arith.addf %76, %1 : vector<16x128xf32>
    %c0_24 = arith.constant 0 : index
    %c0_25 = arith.constant 0 : index
    %78 = vector.load %arg2[%c0_24, %c0_25] : memref<16x128xf32, #tpu.memory_space<vmem>>, vector<16x128xf32>
    tpu.vector_store %arg2[%c0_24, %c0_25], %77 {strides = array<i32>} : memref<16x128xf32, #tpu.memory_space<vmem>>, vector<16x128xf32>,
    return
  }
}

</mosaic_0001>

<bundles_post_ra>
// kernel: mhsa_block_forward.1
= control target key start
LH: loop header
LB: loop body
LE: loop exit
PB: predicated region body
PF: predicated region fallthrough
CT: control target
= control target key end

     0   :  { %vm50_vm0 = vcmask 1040384   ;;  %v2074_v3 = vmov 0.0   ;;  %vm25_vm1 = vcmask 138240   ;;  %vm210_vm2 = vcmask 130048   ;;  %s2075_s9 = smov 112   ;;  %s2076_s10 = smov 96   ;;  %s2673_s0 = inlined_call_operand.vmem [shape: f32[17,256], index: 0, kind: input, shape index: {}]   ;;  %s2674_s1 = inlined_call_operand.vmem [shape: f32[64,64], index: 1, kind: input, shape index: {}]   ;;  %s2675_s2 = inlined_call_operand.vmem [shape: f32[16,128], index: 2, kind: output, shape index: {}]  }
   0x1   :  { %v16_v0 = vld [vmem:[%s2673_s0 + $0x28] sm:$0x1]  ;;  %v15_v1 = vld [vmem:[%s2673_s0 + $0x20] sm:$0x1]  ;;  %v14_v2 = vld [vmem:[%s2673_s0 + $0x18] sm:$0xff]  ;;  %121 = vmatprep.mubr.f32.mxu0 %v2074_v3  ;;  %s2077_s11 = smov 80  }
   0x2   :  { %1617 = vmatprep.subr.msk.mxu0 %vm50_vm0, %v16_v0  ;;  %v13_v4 = vld [vmem:[%s2673_s0 + $0x10] sm:$0xff]  ;;  %v12_v5 = vld [vmem:[%s2673_s0 + $0x8] sm:$0xff]  ;;  %v11_v6 = vld [vmem:[%s2673_s0] sm:$0xff]  ;;  %s2078_s12 = smov 64   ;;  %vm388_vm3 = vcmask 523264   ;;  %s2079_s13 = smov 16  }
   0x3   :  { %1618 = vmatpush1.msk.msra.mxu0 %vm50_vm0, %v15_v1  ;;  %v17_v7 = vld [vmem:[%s2674_s1] sm:$0xff]  ;;  %v18_v8 = vld [vmem:[%s2674_s1 + $0x8] sm:$0xff]  ;;  %v19_v9 = vld [vmem:[%s2674_s1 + $0x10] sm:$0xff]  ;;  %s2080_s14 = smov 32   ;;  %s2081_s15 = smov 48   ;;  %vm778_vm4 = vcmask 261248  }
   0x4   :  { %85 = vmatprep.subr.mxu0 %v14_v2  ;;  %v20_v10 = vld [vmem:[%s2674_s1 + $0x18] sm:$0xff]  ;;  %v21_v11 = vld [vmem:[%s2674_s1 + $0x20] sm:$0xff]  ;;  %v22_v12 = vld [vmem:[%s2674_s1 + $0x28] sm:$0xff]  ;;  %vm799_vm5 = vcmask 392448   ;;  %vm820_vm6 = vcmask 523648   ;;  %vm1451_vm7 = vcmask 654848  }
   0x5   :  { %86 = vmatpush1.msra.mxu0 %v13_v4  ;;  %v23_v13 = vld [vmem:[%s2674_s1 + $0x30] sm:$0xff]  ;;  %v24_v14 = vld [vmem:[%s2674_s1 + $0x38] sm:$0xff]  ;;  %vm1472_vm8 = vcmask 786048   ;;  %vm1493_vm9 = vcmask 917248   ;;  %vm1514_vm10 = vcmask 1048448   ;;  %vm1527_vm11 = vcmask 261120  }
   0x6   :  { %87 = vmatprep.subr.mxu0 %v12_v5 }
   0x7   :  { %88 = vmatpush1.msra.mxu0 %v11_v6 }
   0x8   :  { %1619 = vmatmul.mubr.msk.f32.vlgmr.msra.gmra.mxu0 %vm25_vm1, %v17_v7 }
   0x9   :  { %126 = vmatprep.mubr.f32.mxu0 %v2074_v3 }
   0xc   :  { %1620 = vmatmul.mubr.msk.f32.gmra.mxu0 %vm25_vm1, %v18_v8 }
   0xd   :  { %131 = vmatprep.mubr.f32.mxu0 %v2074_v3 }
  0x10   :  { %1621 = vmatmul.mubr.msk.f32.gmra.mxu0 %vm25_vm1, %v19_v9 }
  0x11   :  { %136 = vmatprep.mubr.f32.mxu0 %v2074_v3 }
  0x14   :  { %1622 = vmatmul.mubr.msk.f32.gmra.mxu0 %vm25_vm1, %v20_v10 }
  0x15   :  { %141 = vmatprep.mubr.f32.mxu0 %v2074_v3 }
  0x18   :  { %1623 = vmatmul.mubr.msk.f32.gmra.mxu0 %vm25_vm1, %v21_v11 }
  0x19   :  { %146 = vmatprep.mubr.f32.mxu0 %v2074_v3 }
  0x1c   :  { %1624 = vmatmul.mubr.msk.f32.gmra.mxu0 %vm25_vm1, %v22_v12 }
  0x1d   :  { %151 = vmatprep.mubr.f32.mxu0 %v2074_v3 }
  0x20   :  { %1625 = vmatmul.mubr.msk.f32.gmra.mxu0 %vm25_vm1, %v23_v13 }
  0x21   :  { %156 = vmatprep.mubr.f32.mxu0 %v2074_v3 }
  0x24   :  { %1626 = vmatmul.mubr.msk.f32.gmra.mxu0 %vm25_vm1, %v24_v14 }
  0xc8   :  { %v123_v15 = vpop.f32.mrf.mxu0 }
  0xc9   :  { %166 = vrot.lane.b32.xlu0 %v123_v15, %s2075_s9  ;;  %1787 = vmatprep.mubr.msk.f32.mxu0 %vm210_vm2, %v123_v15 }
  0xca   :  { %v125_v16 = vpop.f32.mrf.mxu0 }
  0xcc   :  { %v128_v17 = vpop.f32.mrf.mxu0 }
  0xcd   :  { %168 = vrot.lane.b32.xlu0 %v128_v17, %s2075_s9 }
  0xce   :  { %v130_v18 = vpop.f32.mrf.mxu0 }
  0xd0   :  { %v133_v19 = vpop.f32.mrf.mxu0 }
  0xd1   :  { %174 = vrot.lane.b32.xlu0 %v123_v15, %s2076_s10  ;;  %170 = vrot.lane.b32.xlu1 %v133_v19, %s2075_s9 }
  0xd2   :  { %v135_v20 = vpop.f32.mrf.mxu0 }
  0xd4   :  { %v138_v21 = vpop.f32.mrf.mxu0 }
  0xd5   :  { %178 = vrot.lane.b32.xlu0 %v133_v19, %s2076_s10  ;;  %172 = vrot.lane.b32.xlu1 %v138_v21, %s2075_s9 }
  0xd6   :  { %v140_v22 = vpop.f32.mrf.mxu0 }
  0xd8   :  { %v143_v23 = vpop.f32.mrf.mxu0 }
  0xd9   :  { %182 = vrot.lane.b32.xlu0 %v123_v15, %s2077_s11  ;;  %176 = vrot.lane.b32.xlu1 %v128_v17, %s2076_s10 }
  0xda   :  { %v144_v24 = vpop.f32.mrf.mxu0 }
  0xdc   :  { %v148_v25 = vpop.f32.mrf.mxu0 }
  0xdd   :  { %186 = vrot.lane.b32.xlu0 %v133_v19, %s2077_s11  ;;  %180 = vrot.lane.b32.xlu1 %v138_v21, %s2076_s10 }
  0xde   :  { %v149_v26 = vpop.f32.mrf.mxu0 }
  0xdf   :  { %1783 = vmatprep.subr.mxu0 %v149_v26  ;;  %1930 = vmatprep.subr.mxu1 %v149_v26 }
  0xe0   :  { %1784 = vmatpush3.msra.mxu0 %v149_v26  ;;  %1932 = vmatpush3.msra.mxu1 %v149_v26  ;;  %v2158_v27 = vpop.f32.mrf.mxu0 }
  0xe1   :  { %184 = vrot.lane.b32.xlu1 %v128_v17, %s2077_s11  ;;  %861 = vrot.lane.b32.xlu0 %v149_v26, %s2078_s12 }
  0xe2   :  { %1785 = vmatprep.subr.mxu0 %v144_v24  ;;  %1931 = vmatprep.subr.mxu1 %v144_v24  ;;  %v155_v28 = vpop.f32.mrf.mxu0 }
  0xe3   :  { %1786 = vmatpush3.msra.mxu0 %v144_v24  ;;  %1933 = vmatpush3.msra.mxu1 %v144_v24 }
  0xe4   :  { %1788 = vmatmul.mubr.msk.f32.vlgmr.msra.gmra.mxu0 %vm210_vm2, %v128_v17  ;;  %v2163_v29 = vpop.f32.mrf.mxu0 }
  0xe5   :  { %1790 = vmatprep.mubr.msk.f32.mxu0 %vm210_vm2, %v133_v19  ;;  %188 = vrot.lane.b32.xlu1 %v138_v21, %s2077_s11 }
  0xe6   :  { %825 = vrot.lane.b32.xlu0 %v123_v15, %s2078_s12  ;;  %v160_v30 = vpop.f32.mrf.mxu0 }
  0xe8   :  { %1791 = vmatmul.mubr.msk.f32.gmra.mxu0 %vm210_vm2, %v138_v21 }
  0xe9   :  { %859 = vrot.lane.b32.xlu1 %v144_v24, %s2078_s12 }
  0xea   :  { %829 = vrot.lane.b32.xlu0 %v133_v19, %s2078_s12 }
  0xed   :  { %827 = vrot.lane.b32.xlu1 %v128_v17, %s2078_s12 }
  0xf1   :  { %831 = vrot.lane.b32.xlu1 %v138_v21, %s2078_s12 }
 0x13b   :  { %v167_v31 = vpop.permute.xlu0 %166 }
 0x13c   :  { %833 = vrot.lane.b32.xlu0 %v167_v31, %s2078_s12  ;;  %1793 = vmatprep.mubr.msk.f32.mxu0 %vm210_vm2, %v167_v31 }
 0x13f   :  { %v169_v32 = vpop.permute.xlu0 %168 }
 0x140   :  { %835 = vrot.lane.b32.xlu1 %v169_v32, %s2078_s12  ;;  %1794 = vmatmul.mubr.msk.f32.gmra.mxu0 %vm210_vm2, %v169_v32 }
 0x143   :  { %v175_v33 = vpop.permute.xlu0 %174  ;;  %v171_v34 = vpop.permute.xlu1 %170 }
 0x144   :  { %1796 = vmatprep.mubr.msk.f32.mxu1 %vm210_vm2, %v171_v34  ;;  %837 = vrot.lane.b32.xlu0 %v171_v34, %s2078_s12 }
 0x147   :  { %v179_v35 = vpop.permute.xlu0 %178  ;;  %v173_v36 = vpop.permute.xlu1 %172 }
 0x148   :  { %839 = vrot.lane.b32.xlu1 %v173_v36, %s2078_s12  ;;  %841 = vrot.lane.b32.xlu0 %v175_v33, %s2078_s12 }
 0x149   :  { %1797 = vmatmul.mubr.msk.f32.vlgmr.msra.gmra.mxu1 %vm210_vm2, %v173_v36 }
 0x14a   :  { %1799 = vmatprep.mubr.msk.f32.mxu1 %vm210_vm2, %v175_v33 }
 0x14b   :  { %v183_v37 = vpop.permute.xlu0 %182  ;;  %v177_v38 = vpop.permute.xlu1 %176 }
 0x14c   :  { %843 = vrot.lane.b32.xlu1 %v177_v38, %s2078_s12  ;;  %845 = vrot.lane.b32.xlu0 %v179_v35, %s2078_s12 }
 0x14d   :  { %1800 = vmatmul.mubr.msk.f32.gmra.mxu1 %vm210_vm2, %v177_v38 }
 0x14e   :  { %1802 = vmatprep.mubr.msk.f32.mxu1 %vm210_vm2, %v179_v35 }
 0x14f   :  { %v187_v39 = vpop.permute.xlu0 %186  ;;  %v181_v40 = vpop.permute.xlu1 %180 }
 0x150   :  { %847 = vrot.lane.b32.xlu1 %v181_v40, %s2078_s12  ;;  %849 = vrot.lane.b32.xlu0 %v183_v37, %s2078_s12 }
 0x151   :  { %1803 = vmatmul.mubr.msk.f32.gmra.mxu1 %vm210_vm2, %v181_v40 }
 0x152   :  { %1805 = vmatprep.mubr.msk.f32.mxu1 %vm210_vm2, %v183_v37 }
 0x153   :  { %v185_v41 = vpop.permute.xlu1 %184  ;;  %v862_v42 = vpop.permute.xlu0 %861 }
 0x154   :  { %851 = vrot.lane.b32.xlu1 %v185_v41, %s2078_s12  ;;  %853 = vrot.lane.b32.xlu0 %v187_v39, %s2078_s12 }
 0x155   :  { %1806 = vmatmul.mubr.msk.f32.gmra.mxu1 %vm210_vm2, %v185_v41  ;;  %1851 = vmatprep.subr.mxu0 %v862_v42 }
 0x156   :  { %1808 = vmatprep.mubr.msk.f32.mxu1 %vm210_vm2, %v187_v39  ;;  %1852 = vmatpush3.msra.mxu0 %v862_v42 }
 0x157   :  { %v189_v43 = vpop.permute.xlu1 %188 }
 0x158   :  { %v826_v44 = vpop.permute.xlu0 %825  ;;  %855 = vrot.lane.b32.xlu1 %v189_v43, %s2078_s12  ;;  %204 = vrot.lane.b32.xlu0 %v2158_v27, %s2077_s11 }
 0x159   :  { %1809 = vmatmul.mubr.msk.f32.gmra.mxu1 %vm210_vm2, %v189_v43  ;;  %1855 = vmatprep.mubr.msk.f32.mxu0 %vm210_vm2, %v826_v44 }
 0x15b   :  { %v860_v45 = vpop.permute.xlu1 %859 }
 0x15c   :  { %194 = vrot.lane.b32.xlu0 %v2163_v29, %s2075_s9  ;;  %206 = vrot.lane.b32.xlu1 %v2163_v29, %s2077_s11  ;;  %v830_v47 = vpop.permute.xlu0 %829 }
 0x15d   :  { %1853 = vmatprep.subr.mxu0 %v860_v45 }
 0x15e   :  { %1854 = vmatpush3.msra.mxu0 %v860_v45 }
 0x15f   :  { %v828_v46 = vpop.permute.xlu1 %827 }
 0x160   :  { %1856 = vmatmul.mubr.msk.f32.vlgmr.msra.gmra.mxu0 %vm210_vm2, %v828_v46  ;;  %200 = vrot.lane.b32.xlu1 %v2163_v29, %s2076_s10 }
 0x161   :  { %1858 = vmatprep.mubr.msk.f32.mxu0 %vm210_vm2, %v830_v47 }
 0x163   :  { %v832_v48 = vpop.permute.xlu1 %831 }
 0x164   :  { %1859 = vmatmul.mubr.msk.f32.gmra.mxu0 %vm210_vm2, %v832_v48  ;;  %198 = vrot.lane.b32.xlu1 %v2158_v27, %s2076_s10 }
 0x168   :  { %192 = vrot.lane.b32.xlu1 %v2158_v27, %s2075_s9 }
 0x1a4   :  { %v2235_v3 = vpop.f32.mrf.mxu0 }
 0x1a5   :  { %v392_v7 = vsel %vm388_vm3, %v2235_v3, -inf }
 0x1a6   :  { %v2237_v4 = vpop.f32.mrf.mxu0 }
 0x1a7   :  { %v389_v6 = vsel %vm388_vm3, %v2237_v4, -inf }
 0x1a8   :  { %v2239_v5 = vpop.f32.mrf.mxu0 }
 0x1a9   :  { %v398_v9 = vsel %vm388_vm3, %v2239_v5, -inf }
 0x1aa   :  { %v2245_v8 = vpop.f32.mrf.mxu0 }
 0x1ab   :  { %v395_v11 = vsel %vm388_vm3, %v2245_v8, -inf }
 0x1ae   :  { %v834_v49 = vpop.permute.xlu0 %833 }
 0x1af   :  { %1861 = vmatprep.mubr.msk.f32.mxu0 %vm210_vm2, %v834_v49 }
 0x1b2   :  { %v836_v50 = vpop.permute.xlu1 %835 }
 0x1b3   :  { %1862 = vmatmul.mubr.msk.f32.gmra.mxu0 %vm210_vm2, %v836_v50 }
 0x1b6   :  { %v838_v51 = vpop.permute.xlu0 %837 }
 0x1b7   :  { %1864 = vmatprep.mubr.msk.f32.mxu0 %vm210_vm2, %v838_v51 }
 0x1ba   :  { %v840_v52 = vpop.permute.xlu1 %839  ;;  %v842_v53 = vpop.permute.xlu0 %841 }
 0x1bb   :  { %1865 = vmatmul.mubr.msk.f32.gmra.mxu0 %vm210_vm2, %v840_v52 }
 0x1bc   :  { %1867 = vmatprep.mubr.msk.f32.mxu0 %vm210_vm2, %v842_v53 }
 0x1be   :  { %v844_v54 = vpop.permute.xlu1 %843  ;;  %v846_v55 = vpop.permute.xlu0 %845 }
 0x1bf   :  { %1868 = vmatmul.mubr.msk.f32.gmra.mxu0 %vm210_vm2, %v844_v54 }
 0x1c0   :  { %1870 = vmatprep.mubr.msk.f32.mxu0 %vm210_vm2, %v846_v55 }
 0x1c2   :  { %v848_v56 = vpop.permute.xlu1 %847  ;;  %v850_v57 = vpop.permute.xlu0 %849 }
 0x1c3   :  { %1871 = vmatmul.mubr.msk.f32.gmra.mxu0 %vm210_vm2, %v848_v56 }
 0x1c4   :  { %1873 = vmatprep.mubr.msk.f32.mxu0 %vm210_vm2, %v850_v57 }
 0x1c6   :  { %v852_v58 = vpop.permute.xlu1 %851  ;;  %v854_v59 = vpop.permute.xlu0 %853 }
 0x1c7   :  { %1874 = vmatmul.mubr.msk.f32.gmra.mxu0 %vm210_vm2, %v852_v58 }
 0x1c8   :  { %1876 = vmatprep.mubr.msk.f32.mxu0 %vm210_vm2, %v854_v59 }
 0x1ca   :  { %v856_v60 = vpop.permute.xlu1 %855  ;;  %v205_v61 = vpop.permute.xlu0 %204 }
 0x1cb   :  { %1877 = vmatmul.mubr.msk.f32.gmra.mxu0 %vm210_vm2, %v856_v60  ;;  %1230 = vrot.lane.b32.xlu0 %v205_v61, %s2078_s12 }
 0x1ce   :  { %v207_v62 = vpop.permute.xlu1 %206  ;;  %v195_v0 = vpop.permute.xlu0 %194 }
 0x1cf   :  { %1811 = vmatprep.subr.mxu1 %v207_v62  ;;  %1232 = vrot.lane.b32.xlu1 %v207_v62, %s2078_s12 }
 0x1d0   :  { %1812 = vmatpush3.msra.mxu1 %v207_v62 }
 0x1d1   :  { %1813 = vmatprep.subr.mxu1 %v205_v61 }
 0x1d2   :  { %1814 = vmatpush3.msra.mxu1 %v205_v61  ;;  %v201_v63 = vpop.permute.xlu1 %200 }
 0x1d3   :  { %1815 = vmatprep.subr.mxu1 %v201_v63  ;;  %1228 = vrot.lane.b32.xlu1 %v201_v63, %s2078_s12 }
 0x1d4   :  { %1816 = vmatpush3.msra.mxu1 %v201_v63 }
 0x1d6   :  { %v199_v1 = vpop.permute.xlu1 %198 }
 0x1d7   :  { %1224 = vrot.lane.b32.xlu1 %v195_v0, %s2078_s12  ;;  %1817 = vmatprep.subr.mxu1 %v199_v1 }
 0x1d8   :  { %1226 = vrot.lane.b32.xlu0 %v199_v1, %s2078_s12  ;;  %1818 = vmatpush3.msra.mxu1 %v199_v1 }
 0x1d9   :  { %1819 = vmatprep.subr.mxu1 %v195_v0 }
 0x1da   :  { %1820 = vmatpush3.msra.mxu1 %v195_v0  ;;  %v193_v2 = vpop.permute.xlu1 %192 }
 0x1db   :  { %1821 = vmatprep.subr.mxu1 %v193_v2 }
 0x1dc   :  { %1222 = vrot.lane.b32.xlu0 %v193_v2, %s2078_s12  ;;  %1822 = vmatpush3.msra.mxu1 %v193_v2 }
 0x1dd   :  { %1823 = vmatprep.subr.mxu1 %v2163_v29 }
 0x1de   :  { %1824 = vmatpush3.msra.mxu1 %v2163_v29 }
 0x1df   :  { %1825 = vmatprep.subr.mxu1 %v2158_v27 }
 0x1e0   :  { %1826 = vmatpush3.msra.mxu1 %v2158_v27 }
 0x1fb   :  { %390 = vmax.xlane.f32.xlu0 %v389_v6  ;;  %393 = vmax.xlane.f32.xlu1 %v392_v7 }
 0x1ff   :  { %399 = vmax.xlane.f32.xlu0 %v398_v9 }
 0x200   :  { %v2249_v10 = vpop.f32.mrf.mxu0 }
 0x201   :  { %v404_v14 = vsel %vm388_vm3, %v2249_v10, -inf }
 0x202   :  { %v2253_v12 = vpop.f32.mrf.mxu0 }
 0x203   :  { %396 = vmax.xlane.f32.xlu0 %v395_v11  ;;  %v401_v13 = vsel %vm388_vm3, %v2253_v12, -inf }
 0x204   :  { %402 = vmax.xlane.f32.xlu1 %v401_v13 }
 0x207   :  { %405 = vmax.xlane.f32.xlu0 %v404_v14 }
 0x209   :  { %v2259_v15 = vpop.f32.mrf.mxu1 }
 0x20a   :  { %v410_v16 = vsel %vm388_vm3, %v2259_v15, -inf }
 0x20b   :  { %v2263_v17 = vpop.f32.mrf.mxu1  ;;  %411 = vmax.xlane.f32.xlu0 %v410_v16 }
 0x20c   :  { %v407_v18 = vsel %vm388_vm3, %v2263_v17, -inf }
 0x20d   :  { %v2267_v19 = vpop.f32.mrf.mxu1  ;;  %408 = vmax.xlane.f32.xlu1 %v407_v18 }
 0x20e   :  { %v416_v20 = vsel %vm388_vm3, %v2267_v19, -inf }
 0x20f   :  { %v2271_v21 = vpop.f32.mrf.mxu1  ;;  %417 = vmax.xlane.f32.xlu0 %v416_v20 }
 0x210   :  { %v413_v22 = vsel %vm388_vm3, %v2271_v21, -inf }
 0x211   :  { %v2275_v23 = vpop.f32.mrf.mxu1  ;;  %414 = vmax.xlane.f32.xlu1 %v413_v22 }
 0x212   :  { %v422_v24 = vsel %vm388_vm3, %v2275_v23, -inf }
 0x213   :  { %v2279_v25 = vpop.f32.mrf.mxu1  ;;  %423 = vmax.xlane.f32.xlu0 %v422_v24 }
 0x214   :  { %v419_v26 = vsel %vm388_vm3, %v2279_v25, -inf }
 0x215   :  { %v2283_v28 = vpop.f32.mrf.mxu1  ;;  %420 = vmax.xlane.f32.xlu1 %v419_v26 }
 0x216   :  { %v428_v30 = vsel %vm388_vm3, %v2283_v28, -inf }
 0x217   :  { %v2287_v31 = vpop.f32.mrf.mxu1  ;;  %429 = vmax.xlane.f32.xlu0 %v428_v30 }
 0x218   :  { %v425_v32 = vsel %vm388_vm3, %v2287_v31, -inf }
 0x219   :  { %426 = vmax.xlane.f32.xlu1 %v425_v32  ;;  %v2291_v33 = vpop.f32.mrf.mxu1 }
 0x21a   :  { %v434_v40 = vsel %vm388_vm3, %v2291_v33, -inf }
 0x21b   :  { %v2301_v38 = vpop.f32.mrf.mxu1 }
 0x21c   :  { %v431_v41 = vsel %vm388_vm3, %v2301_v38, -inf }
 0x220   :  { %v2293_v34 = vpop.f32.mrf.mxu0 }
 0x221   :  { %v1045_v35 = vsel %vm388_vm3, %v2293_v34, -inf }
 0x222   :  { %1046 = vmax.xlane.f32.xlu0 %v1045_v35  ;;  %v2297_v36 = vpop.f32.mrf.mxu0 }
 0x223   :  { %v1042_v37 = vsel %vm388_vm3, %v2297_v36, -inf }
 0x224   :  { %v2303_v39 = vpop.f32.mrf.mxu0  ;;  %1043 = vmax.xlane.f32.xlu1 %v1042_v37 }
 0x225   :  { %v1051_v43 = vsel %vm388_vm3, %v2303_v39, -inf }
 0x226   :  { %435 = vmax.xlane.f32.xlu0 %v434_v40  ;;  %v2309_v42 = vpop.f32.mrf.mxu0 }
 0x227   :  { %v1048_v44 = vsel %vm388_vm3, %v2309_v42, -inf }
 0x228   :  { %432 = vmax.xlane.f32.xlu1 %v431_v41 }
 0x22a   :  { %1052 = vmax.xlane.f32.xlu0 %v1051_v43 }
 0x22c   :  { %1049 = vmax.xlane.f32.xlu1 %v1048_v44 }
 0x23d   :  { %v2318_v46 = vpop.permute.xlu0 %1230 }
 0x241   :  { %v2315_v45 = vpop.permute.xlu1 %1232 }
 0x242   :  { %1879 = vmatprep.subr.mxu1 %v2315_v45 }
 0x245   :  { %v2320_v47 = vpop.permute.xlu1 %1228 }
 0x249   :  { %v2324_v49 = vpop.permute.xlu1 %1224 }
 0x24a   :  { %v2322_v48 = vpop.permute.xlu0 %1226 }
 0x24e   :  { %v2326_v50 = vpop.permute.xlu0 %1222 }
 0x273   :  { %v2328_v51 = vpop.f32.mrf.mxu0 }
 0x275   :  { %v2332_v56 = vpop.f32.mrf.mxu0 }
 0x276   :  { %v1054_v24 = vsel %vm388_vm3, %v2332_v56, -inf }
 0x27b   :  { %v2334_v60 = vpop.f32.mrf.mxu0 }
 0x27d   :  { %v2337_v0 = vpop.f32.mrf.mxu0 }
 0x284   :  { %v391_v52 = vpop.xlane.xlu0 %390  ;;  %v394_v53 = vpop.xlane.xlu1 %393 }
 0x285   :  { %v437_v54 = vsub.f32 %v2237_v4, %v391_v52  ;;  %v438_v55 = vsub.f32 %v2235_v3, %v394_v53  ;;  %v2340_v3 = vpop.f32.mrf.mxu0  ;;  %v1057_v53 = vsel %vm388_vm3, %v2328_v51, -inf }
 0x287   :  { %v453_v57 = vmul.f32 1.442695, %v437_v54  ;;  %v455_v58 = vmul.f32 1.442695, %v438_v55  ;;  %v2342_v6 = vpop.f32.mrf.mxu0 }
 0x288   :  { %v400_v59 = vpop.xlane.xlu0 %399 }
 0x289   :  { %1942 = vpow2.f32 %v453_v57  ;;  %v440_v61 = vsub.f32 %v2239_v5, %v400_v59  ;;  %v2352_v14 = vpop.f32.mrf.mxu0 }
 0x28a   :  { %1944 = vpow2.f32 %v455_v58 }
 0x28b   :  { %v459_v62 = vmul.f32 1.442695, %v440_v61  ;;  %v2361_v26 = vpop.f32.mrf.mxu0 }
 0x28c   :  { %v397_v63 = vpop.xlane.xlu0 %396 }
 0x28d   :  { %1946 = vpow2.f32 %v459_v62  ;;  %v439_v1 = vsub.f32 %v2245_v8, %v397_v63  ;;  %v403_v4 = vpop.xlane.xlu1 %402  ;;  %v2370_v41 = vpop.f32.mrf.mxu0 }
 0x28e   :  { %v441_v20 = vsub.f32 %v2253_v12, %v403_v4  ;;  %v1060_v12 = vsel %vm388_vm3, %v2337_v0, -inf }
 0x28f   :  { %v457_v2 = vmul.f32 1.442695, %v439_v1  ;;  %v2378_v57 = vpop.f32.mrf.mxu0 }
 0x290   :  { %v406_v9 = vpop.xlane.xlu0 %405  ;;  %v461_v37 = vmul.f32 1.442695, %v441_v20 }
 0x291   :  { %1948 = vpow2.f32 %v457_v2  ;;  %v442_v44 = vsub.f32 %v2249_v10, %v406_v9  ;;  %v1063_v10 = vsel %vm388_vm3, %v2334_v60, -inf  ;;  %v2386_v1 = vpop.f32.mrf.mxu0  ;;  %v1069_v9 = vsel %vm388_vm3, %v2340_v3, -inf }
 0x292   :  { %1950 = vpow2.f32 %v461_v37 }
 0x293   :  { %v463_v58 = vmul.f32 1.442695, %v442_v44  ;;  %v1081_v44 = vsel %vm388_vm3, %v2370_v41, -inf }
 0x294   :  { %v412_v22 = vpop.xlane.xlu0 %411 }
 0x295   :  { %v444_v59 = vsub.f32 %v2259_v15, %v412_v22 }
 0x296   :  { %v2344_v7 = vpop.eup %1942  ;;  %v409_v5 = vpop.xlane.xlu1 %408 }
 0x297   :  { %v2346_v11 = vpop.eup %1944  ;;  %v485_v13 = vsel %vm388_vm3, %v2344_v7, 0.0  ;;  %v443_v40 = vsub.f32 %v2263_v17, %v409_v5  ;;  %v1066_v17 = vsel %vm388_vm3, %v2342_v6, -inf  ;;  %v467_v4 = vmul.f32 1.442695, %v444_v59 }
 0x298   :  { %486 = vadd.xlane.f32.xlu0 %v485_v13  ;;  %v488_v8 = vsel %vm388_vm3, %v2346_v11, 0.0  ;;  %v418_v43 = vpop.xlane.xlu0 %417 }
 0x299   :  { %489 = vadd.xlane.f32.xlu1 %v488_v8  ;;  %v465_v54 = vmul.f32 1.442695, %v443_v40  ;;  %v446_v15 = vsub.f32 %v2267_v19, %v418_v43  ;;  %v2394_v8 = vpop.f32.mrf.mxu0 }
 0x29a   :  { %v2354_v16 = vpop.eup %1946  ;;  %v415_v30 = vpop.xlane.xlu1 %414 }
 0x29b   :  { %v494_v18 = vsel %vm388_vm3, %v2354_v16, 0.0  ;;  %v445_v55 = vsub.f32 %v2271_v21, %v415_v30  ;;  %1952 = vpow2.f32 %v465_v54  ;;  %v1072_v21 = vsel %vm388_vm3, %v2361_v26, -inf }
 0x29c   :  { %495 = vadd.xlane.f32.xlu0 %v494_v18  ;;  %v424_v62 = vpop.xlane.xlu0 %423  ;;  %1954 = vpow2.f32 %v463_v58  ;;  %v471_v22 = vmul.f32 1.442695, %v446_v15 }
 0x29d   :  { %1055 = vmax.xlane.f32.xlu1 %v1054_v24  ;;  %v469_v61 = vmul.f32 1.442695, %v445_v55  ;;  %v448_v19 = vsub.f32 %v2275_v23, %v424_v62  ;;  %v1075_v24 = vsel %vm388_vm3, %v2352_v14, -inf }
 0x29e   :  { %v2363_v32 = vpop.eup %1948  ;;  %v421_v52 = vpop.xlane.xlu1 %420 }
 0x29f   :  { %v491_v35 = vsel %vm388_vm3, %v2363_v32, 0.0  ;;  %v447_v63 = vsub.f32 %v2279_v25, %v421_v52  ;;  %1956 = vpow2.f32 %v469_v61  ;;  %v1078_v25 = vsel %vm388_vm3, %v2378_v57, -inf  ;;  %v2402_v37 = vpop.eup %1950 }
 0x2a0   :  { %492 = vadd.xlane.f32.xlu0 %v491_v35  ;;  %v430_v20 = vpop.xlane.xlu0 %429  ;;  %1958 = vpow2.f32 %v467_v4  ;;  %v1084_v35 = vsel %vm388_vm3, %v2394_v8, -inf  ;;  %v475_v43 = vmul.f32 1.442695, %v448_v19 }
 0x2a1   :  { %1061 = vmax.xlane.f32.xlu1 %v1060_v12  ;;  %v473_v5 = vmul.f32 1.442695, %v447_v63  ;;  %v450_v23 = vsub.f32 %v2283_v28, %v430_v20  ;;  %v1087_v28 = vsel %vm388_vm3, %v2386_v1, -inf }
 0x2a2   :  { %v427_v2 = vpop.xlane.xlu1 %426 }
 0x2a3   :  { %v449_v13 = vsub.f32 %v2287_v31, %v427_v2  ;;  %1960 = vpow2.f32 %v473_v5  ;;  %v479_v55 = vmul.f32 1.442695, %v450_v23 }
 0x2a4   :  { %1058 = vmax.xlane.f32.xlu0 %v1057_v53  ;;  %1962 = vpow2.f32 %v471_v22  ;;  %v497_v53 = vsel %vm388_vm3, %v2402_v37, 0.0 }
 0x2a5   :  { %1067 = vmax.xlane.f32.xlu1 %v1066_v17  ;;  %v477_v30 = vmul.f32 1.442695, %v449_v13 }
 0x2a7   :  { %1964 = vpow2.f32 %v477_v30 }
 0x2a8   :  { %1064 = vmax.xlane.f32.xlu0 %v1063_v10  ;;  %v2410_v54 = vpop.eup %1952  ;;  %1966 = vpow2.f32 %v475_v43 }
 0x2a9   :  { %1073 = vmax.xlane.f32.xlu1 %v1072_v21  ;;  %v2415_v58 = vpop.eup %1954 }
 0x2ab   :  { %v1047_v12 = vpop.xlane.xlu0 %1046 }
 0x2ac   :  { %1070 = vmax.xlane.f32.xlu0 %v1069_v9  ;;  %v1091_v17 = vsub.f32 %v2293_v34, %v1047_v12  ;;  %v2419_v61 = vpop.eup %1956  ;;  %v500_v34 = vsel %vm388_vm3, %v2415_v58, 0.0 }
 0x2ad   :  { %1079 = vmax.xlane.f32.xlu1 %v1078_v25  ;;  %v1044_v18 = vpop.xlane.xlu1 %1043  ;;  %v2424_v21 = vpop.eup %1958  ;;  %v509_v2 = vsel %vm388_vm3, %v2419_v61, 0.0 }
 0x2ae   :  { %v1090_v31 = vsub.f32 %v2297_v36, %v1044_v18  ;;  %v1108_v62 = vmul.f32 1.442695, %v1091_v17  ;;  %v506_v9 = vsel %vm388_vm3, %v2424_v21, 0.0 }
 0x2af   :  { %v436_v59 = vpop.xlane.xlu0 %435 }
 0x2b0   :  { %1076 = vmax.xlane.f32.xlu0 %v1075_v24  ;;  %v1106_v52 = vmul.f32 1.442695, %v1090_v31  ;;  %v452_v63 = vsub.f32 %v2291_v33, %v436_v59  ;;  %v2428_v4 = vpop.eup %1960 }
 0x2b1   :  { %1085 = vmax.xlane.f32.xlu1 %v1084_v35  ;;  %v433_v40 = vpop.xlane.xlu1 %432  ;;  %v2432_v5 = vpop.eup %1962  ;;  %v515_v33 = vsel %vm388_vm3, %v2428_v4, 0.0 }
 0x2b2   :  { %v451_v36 = vsub.f32 %v2301_v38, %v433_v40  ;;  %1968 = vpow2.f32 %v1106_v52  ;;  %v503_v38 = vsel %vm388_vm3, %v2410_v54, 0.0  ;;  %v483_v15 = vmul.f32 1.442695, %v452_v63 }
 0x2b3   :  { %1970 = vpow2.f32 %v479_v55  ;;  %v512_v25 = vsel %vm388_vm3, %v2432_v5, 0.0 }
 0x2b4   :  { %1082 = vmax.xlane.f32.xlu0 %v1081_v44  ;;  %v481_v10 = vmul.f32 1.442695, %v451_v36  ;;  %v2436_v13 = vpop.eup %1964 }
 0x2b5   :  { %498 = vadd.xlane.f32.xlu1 %v497_v53  ;;  %v2440_v18 = vpop.eup %1966  ;;  %v521_v20 = vsel %vm388_vm3, %v2436_v13, 0.0  ;;  %v1050_v52 = vpop.xlane.xlu1 %1049 }
 0x2b6   :  { %1972 = vpow2.f32 %v481_v10  ;;  %v518_v19 = vsel %vm388_vm3, %v2440_v18, 0.0  ;;  %v1092_v36 = vsub.f32 %v2309_v42, %v1050_v52  ;;  %v1053_v53 = vpop.xlane.xlu0 %1052 }
 0x2b7   :  { %1974 = vpow2.f32 %v1108_v62  ;;  %v1093_v17 = vsub.f32 %v2303_v39, %v1053_v53 }
 0x2b8   :  { %1088 = vmax.xlane.f32.xlu0 %v1087_v28  ;;  %1976 = vpow2.f32 %v483_v15  ;;  %v1110_v55 = vmul.f32 1.442695, %v1092_v36 }
 0x2b9   :  { %504 = vadd.xlane.f32.xlu1 %v503_v38  ;;  %v1112_v28 = vmul.f32 1.442695, %v1093_v17 }
 0x2ba   :  { %1978 = vpow2.f32 %v1110_v55 }
 0x2bb   :  { %1980 = vpow2.f32 %v1112_v28 }
 0x2bc   :  { %501 = vadd.xlane.f32.xlu0 %v500_v34 }
 0x2bd   :  { %510 = vadd.xlane.f32.xlu1 %v509_v2 }
 0x2bf   :  { %v2444_v22 = vpop.eup %1968 }
 0x2c0   :  { %507 = vadd.xlane.f32.xlu0 %v506_v9  ;;  %v2448_v24 = vpop.eup %1970  ;;  %v1138_v30 = vsel %vm388_vm3, %v2444_v22, 0.0 }
 0x2c1   :  { %516 = vadd.xlane.f32.xlu1 %v515_v33  ;;  %v524_v35 = vsel %vm388_vm3, %v2448_v24, 0.0 }
 0x2c3   :  { %v2452_v31 = vpop.eup %1972 }
 0x2c4   :  { %513 = vadd.xlane.f32.xlu0 %v512_v25  ;;  %v2456_v40 = vpop.eup %1974  ;;  %v527_v12 = vsel %vm388_vm3, %v2452_v31, 0.0 }
 0x2c5   :  { %522 = vadd.xlane.f32.xlu1 %v521_v20  ;;  %v1141_v43 = vsel %vm388_vm3, %v2456_v40, 0.0  ;;  %v2462_v23 = vpop.eup %1976 }
 0x2c6   :  { %v530_v44 = vsel %vm388_vm3, %v2462_v23, 0.0 }
 0x2c7   :  { %v2472_v59 = vpop.eup %1978 }
 0x2c8   :  { %519 = vadd.xlane.f32.xlu0 %v518_v19  ;;  %v1144_v10 = vsel %vm388_vm3, %v2472_v59, 0.0 }
 0x2c9   :  { %1139 = vadd.xlane.f32.xlu1 %v1138_v30 }
 0x2cc   :  { %525 = vadd.xlane.f32.xlu0 %v524_v35 }
 0x2cd   :  { %528 = vadd.xlane.f32.xlu1 %v527_v12 }
 0x2d0   :  { %1142 = vadd.xlane.f32.xlu0 %v1141_v43 }
 0x2d4   :  { %531 = vadd.xlane.f32.xlu0 %v530_v44 }
 0x2de   :  { %1220 = vrot.lane.b32.xlu1 %v2163_v29, %s2078_s12  ;;  %v2476_v29 = vpop.eup %1980 }
 0x2df   :  { %v1147_v42 = vsel %vm388_vm3, %v2476_v29, 0.0 }
 0x2ea   :  { %1218 = vrot.lane.b32.xlu0 %v2158_v27, %s2078_s12 }
 0x302   :  { %1145 = vadd.xlane.f32.xlu1 %v1144_v10 }
 0x309   :  { %1148 = vadd.xlane.f32.xlu0 %v1147_v42 }
 0x321   :  { %v487_v27 = vpop.xlane.xlu0 %486 }
 0x322   :  { %1982 = vrcp.f32 %v487_v27  ;;  %v490_v38 = vpop.xlane.xlu1 %489 }
 0x323   :  { %1984 = vrcp.f32 %v490_v38 }
 0x325   :  { %v496_v39 = vpop.xlane.xlu0 %495 }
 0x326   :  { %v1056_v62 = vpop.xlane.xlu1 %1055  ;;  %1986 = vrcp.f32 %v496_v39 }
 0x327   :  { %v1094_v63 = vsub.f32 %v2332_v56, %v1056_v62 }
 0x329   :  { %v1114_v34 = vmul.f32 1.442695, %v1094_v63  ;;  %v493_v2 = vpop.xlane.xlu0 %492 }
 0x32a   :  { %1988 = vrcp.f32 %v493_v2  ;;  %v1062_v15 = vpop.xlane.xlu1 %1061 }
 0x32b   :  { %1990 = vpow2.f32 %v1114_v34  ;;  %v1096_v9 = vsub.f32 %v2337_v0, %v1062_v15 }
 0x32d   :  { %v1118_v33 = vmul.f32 1.442695, %v1096_v9  ;;  %v1059_v25 = vpop.xlane.xlu0 %1058 }
 0x32e   :  { %v1095_v20 = vsub.f32 %v2328_v51, %v1059_v25  ;;  %v1068_v19 = vpop.xlane.xlu1 %1067 }
 0x32f   :  { %v1983_v30 = vpop.eup %1982  ;;  %1992 = vpow2.f32 %v1118_v33  ;;  %v1098_v35 = vsub.f32 %v2342_v6, %v1068_v19 }
 0x330   :  { %v1985_v12 = vpop.eup %1984  ;;  %v1116_v43 = vmul.f32 1.442695, %v1095_v20  ;;  %v534_v56 = vmul.f32 %v1983_v30, %v2344_v7 }
 0x331   :  { %v536_v44 = vmul.f32 %v1985_v12, %v2346_v11  ;;  %v1122_v52 = vmul.f32 1.442695, %v1098_v35  ;;  %v1065_v36 = vpop.xlane.xlu0 %1064 }
 0x332   :  { %1994 = vpow2.f32 %v1116_v43  ;;  %v1097_v0 = vsub.f32 %v2334_v60, %v1065_v36  ;;  %1827 = vmatprep.mubr.msk.f32.mxu1 %vm388_vm3, %v534_v56  ;;  %v1074_v53 = vpop.xlane.xlu1 %1073 }
 0x333   :  { %1996 = vpow2.f32 %v1122_v52  ;;  %v1100_v51 = vsub.f32 %v2361_v26, %v1074_v53  ;;  %1828 = vmatmul.mubr.msk.f32.vlgmr.msra.gmra.mxu1 %vm388_vm3, %v536_v44  ;;  %v1987_v11 = vpop.eup %1986 }
 0x334   :  { %v1120_v6 = vmul.f32 1.442695, %v1097_v0  ;;  %1880 = vmatpush3.msra.mxu1 %v2315_v45  ;;  %v540_v39 = vmul.f32 %v1987_v11, %v2354_v16 }
 0x335   :  { %v1126_v55 = vmul.f32 1.442695, %v1100_v51  ;;  %1881 = vmatprep.subr.mxu1 %v2318_v46  ;;  %v1071_v7 = vpop.xlane.xlu0 %1070 }
 0x336   :  { %1998 = vpow2.f32 %v1120_v6  ;;  %v1099_v17 = vsub.f32 %v2340_v3, %v1071_v7  ;;  %1882 = vmatpush3.msra.mxu1 %v2318_v46  ;;  %v1080_v60 = vpop.xlane.xlu1 %1079 }
 0x337   :  { %v1989_v28 = vpop.eup %1988  ;;  %2000 = vpow2.f32 %v1126_v55  ;;  %1883 = vmatprep.subr.mxu1 %v2320_v47  ;;  %v1102_v26 = vsub.f32 %v2378_v57, %v1080_v60 }
 0x338   :  { %v2496_v10 = vpop.eup %1990  ;;  %v1124_v45 = vmul.f32 1.442695, %v1099_v17  ;;  %1884 = vmatpush3.msra.mxu1 %v2320_v47  ;;  %v538_v42 = vmul.f32 %v1989_v28, %v2363_v32 }
 0x339   :  { %v1130_v27 = vmul.f32 1.442695, %v1102_v26  ;;  %1885 = vmatprep.subr.mxu1 %v2322_v48  ;;  %v1077_v3 = vpop.xlane.xlu0 %1076  ;;  %v1150_v46 = vsel %vm388_vm3, %v2496_v10, 0.0 }
 0x33a   :  { %2002 = vpow2.f32 %v1124_v45  ;;  %v1101_v38 = vsub.f32 %v2352_v14, %v1077_v3  ;;  %1886 = vmatpush3.msra.mxu1 %v2322_v48  ;;  %1830 = vmatprep.mubr.msk.f32.mxu1 %vm388_vm3, %v538_v42  ;;  %v1086_v57 = vpop.xlane.xlu1 %1085 }
 0x33b   :  { %2004 = vpow2.f32 %v1130_v27  ;;  %1887 = vmatprep.subr.mxu1 %v2324_v49  ;;  %1151 = vadd.xlane.f32.xlu1 %v1150_v46  ;;  %v1104_v47 = vsub.f32 %v2394_v8, %v1086_v57 }
 0x33c   :  { %v2509_v32 = vpop.eup %1992  ;;  %v1128_v62 = vmul.f32 1.442695, %v1101_v38  ;;  %1831 = vmatmul.mubr.msk.f32.gmra.mxu1 %vm388_vm3, %v540_v39 }
 0x33d   :  { %v1134_v63 = vmul.f32 1.442695, %v1104_v47  ;;  %1888 = vmatpush3.msra.mxu1 %v2324_v49  ;;  %v1083_v48 = vpop.xlane.xlu0 %1082  ;;  %v1156_v14 = vsel %vm388_vm3, %v2509_v32, 0.0 }
 0x33e   :  { %2006 = vpow2.f32 %v1128_v62  ;;  %1889 = vmatprep.subr.mxu1 %v2326_v50  ;;  %v1103_v16 = vsub.f32 %v2370_v41, %v1083_v48  ;;  %v499_v34 = vpop.xlane.xlu1 %498 }
 0x33f   :  { %v2517_v2 = vpop.eup %1994  ;;  %2008 = vpow2.f32 %v1134_v63  ;;  %1890 = vmatpush3.msra.mxu1 %v2326_v50  ;;  %1157 = vadd.xlane.f32.xlu1 %v1156_v14 }
 0x340   :  { %v2520_v8 = vpop.eup %1996  ;;  %v1132_v15 = vmul.f32 1.442695, %v1103_v16  ;;  %2010 = vrcp.f32 %v499_v34  ;;  %v1153_v49 = vsel %vm388_vm3, %v2517_v2, 0.0 }
 0x341   :  { %1154 = vadd.xlane.f32.xlu0 %v1153_v49  ;;  %v1089_v9 = vpop.xlane.xlu0 %1088  ;;  %v1162_v33 = vsel %vm388_vm3, %v2520_v8, 0.0 }
 0x342   :  { %2012 = vpow2.f32 %v1132_v15  ;;  %v1105_v41 = vsub.f32 %v2386_v1, %v1089_v9  ;;  %v505_v25 = vpop.xlane.xlu1 %504 }
 0x343   :  { %v2527_v20 = vpop.eup %1998  ;;  %1163 = vadd.xlane.f32.xlu1 %v1162_v33  ;;  %2014 = vrcp.f32 %v505_v25 }
 0x344   :  { %v2529_v50 = vpop.eup %2000  ;;  %v1136_v19 = vmul.f32 1.442695, %v1105_v41  ;;  %v1159_v30 = vsel %vm388_vm3, %v2527_v20, 0.0 }
 0x345   :  { %1160 = vadd.xlane.f32.xlu0 %v1159_v30  ;;  %v502_v35 = vpop.xlane.xlu0 %501  ;;  %v1168_v12 = vsel %vm388_vm3, %v2529_v50, 0.0 }
 0x346   :  { %2016 = vpow2.f32 %v1136_v19  ;;  %v511_v43 = vpop.xlane.xlu1 %510 }
 0x347   :  { %v2535_v56 = vpop.eup %2002  ;;  %2018 = vrcp.f32 %v502_v35  ;;  %1169 = vadd.xlane.f32.xlu1 %v1168_v12 }
 0x348   :  { %v2537_v1 = vpop.eup %2004  ;;  %v1165_v44 = vsel %vm388_vm3, %v2535_v56, 0.0  ;;  %2020 = vrcp.f32 %v511_v43 }
 0x349   :  { %1166 = vadd.xlane.f32.xlu0 %v1165_v44  ;;  %v508_v52 = vpop.xlane.xlu0 %507  ;;  %v1174_v36 = vsel %vm388_vm3, %v2537_v1, 0.0 }
 0x34a   :  { %2022 = vrcp.f32 %v508_v52  ;;  %v517_v0 = vpop.xlane.xlu1 %516 }
 0x34b   :  { %v2543_v53 = vpop.eup %2006  ;;  %1175 = vadd.xlane.f32.xlu1 %v1174_v36  ;;  %2024 = vrcp.f32 %v517_v0 }
 0x34c   :  { %v2545_v51 = vpop.eup %2008  ;;  %v1171_v6 = vsel %vm388_vm3, %v2543_v53, 0.0 }
 0x34d   :  { %v2011_v55 = vpop.eup %2010  ;;  %1172 = vadd.xlane.f32.xlu0 %v1171_v6  ;;  %v514_v7 = vpop.xlane.xlu0 %513  ;;  %v1180_v11 = vsel %vm388_vm3, %v2545_v51, 0.0 }
 0x34e   :  { %2026 = vrcp.f32 %v514_v7  ;;  %v523_v17 = vpop.xlane.xlu1 %522  ;;  %v542_v60 = vmul.f32 %v2011_v55, %v2402_v37 }
 0x34f   :  { %v2552_v28 = vpop.eup %2012  ;;  %1181 = vadd.xlane.f32.xlu1 %v1180_v11  ;;  %2028 = vrcp.f32 %v523_v17 }
 0x350   :  { %1833 = vmatprep.mubr.msk.f32.mxu1 %vm388_vm3, %v542_v60  ;;  %v1177_v26 = vsel %vm388_vm3, %v2552_v28, 0.0  ;;  %v2015_v42 = vpop.eup %2014 }
 0x351   :  { %1178 = vadd.xlane.f32.xlu0 %v1177_v26  ;;  %v520_v45 = vpop.xlane.xlu0 %519  ;;  %v546_v62 = vmul.f32 %v2015_v42, %v2410_v54 }
 0x352   :  { %2030 = vrcp.f32 %v520_v45  ;;  %v1140_v27 = vpop.xlane.xlu1 %1139 }
 0x353   :  { %v2557_v3 = vpop.eup %2016 }
 0x354   :  { %v2019_v46 = vpop.eup %2018  ;;  %v1183_v37 = vsel %vm388_vm3, %v2557_v3, 0.0 }
 0x355   :  { %1184 = vadd.xlane.f32.xlu0 %v1183_v37  ;;  %v526_v38 = vpop.xlane.xlu0 %525  ;;  %v544_v57 = vmul.f32 %v2019_v46, %v2415_v58  ;;  %v2021_v39 = vpop.eup %2020 }
 0x356   :  { %2032 = vrcp.f32 %v526_v38  ;;  %v529_v47 = vpop.xlane.xlu1 %528  ;;  %v550_v15 = vmul.f32 %v2021_v39, %v2419_v61 }
 0x357   :  { %v2023_v63 = vpop.eup %2022  ;;  %1834 = vmatmul.mubr.msk.f32.gmra.mxu1 %vm388_vm3, %v544_v57  ;;  %2034 = vrcp.f32 %v529_v47 }
 0x358   :  { %1836 = vmatprep.mubr.msk.f32.mxu1 %vm388_vm3, %v546_v62  ;;  %v548_v48 = vmul.f32 %v2023_v63, %v2424_v21  ;;  %v2025_v16 = vpop.eup %2024  ;;  %2036 = vrcp.f32 %v1140_v27 }
 0x359   :  { %v1143_v14 = vpop.xlane.xlu0 %1142  ;;  %v554_v21 = vmul.f32 %v2025_v16, %v2428_v4 }
 0x35a   :  { %v1221_v34 = vpop.permute.xlu1 %1220 }
 0x35b   :  { %v2027_v49 = vpop.eup %2026  ;;  %1837 = vmatmul.mubr.msk.f32.gmra.mxu1 %vm388_vm3, %v548_v48  ;;  %1891 = vmatprep.subr.mxu1 %v1221_v34 }
 0x35c   :  { %1839 = vmatprep.mubr.msk.f32.mxu1 %vm388_vm3, %v550_v15  ;;  %1892 = vmatpush3.msra.mxu1 %v1221_v34  ;;  %v552_v54 = vmul.f32 %v2027_v49, %v2432_v5  ;;  %v2029_v9 = vpop.eup %2028 }
 0x35d   :  { %v532_v58 = vpop.xlane.xlu0 %531  ;;  %v558_v25 = vmul.f32 %v2029_v9, %v2436_v13 }
 0x35e   :  { %2038 = vrcp.f32 %v532_v58 }
 0x35f   :  { %v2031_v33 = vpop.eup %2030  ;;  %1840 = vmatmul.mubr.msk.f32.gmra.mxu1 %vm388_vm3, %v552_v54  ;;  %2040 = vrcp.f32 %v1143_v14 }
 0x360   :  { %1842 = vmatprep.mubr.msk.f32.mxu1 %vm388_vm3, %v554_v21  ;;  %v556_v61 = vmul.f32 %v2031_v33, %v2440_v18 }
 0x361   :  { %v1219_v41 = vpop.permute.xlu0 %1218 }
 0x362   :  { %1893 = vmatprep.subr.mxu1 %v1219_v41 }
 0x363   :  { %v2033_v19 = vpop.eup %2032  ;;  %1843 = vmatmul.mubr.msk.f32.gmra.mxu1 %vm388_vm3, %v556_v61 }
 0x364   :  { %v2035_v5 = vpop.eup %2034  ;;  %1845 = vmatprep.mubr.msk.f32.mxu1 %vm388_vm3, %v558_v25  ;;  %1894 = vmatpush3.msra.mxu1 %v1219_v41  ;;  %v560_v4 = vmul.f32 %v2033_v19, %v2448_v24 }
 0x365   :  { %v562_v30 = vmul.f32 %v2035_v5, %v2452_v31  ;;  %v2037_v18 = vpop.eup %2036 }
 0x366   :  { %v1187_v43 = vmul.f32 %v2037_v18, %v2444_v22 }
 0x367   :  { %1846 = vmatmul.mubr.msk.f32.gmra.mxu1 %vm388_vm3, %v560_v4 }
 0x368   :  { %1848 = vmatprep.mubr.msk.f32.mxu1 %vm388_vm3, %v562_v30 }
 0x36b   :  { %v2039_v35 = vpop.eup %2038 }
 0x36c   :  { %v564_v12 = vmul.f32 %v2039_v35, %v2462_v23  ;;  %v2041_v13 = vpop.eup %2040 }
 0x36d   :  { %v1189_v44 = vmul.f32 %v2041_v13, %v2456_v40 }
 0x36e   :  { %1849 = vmatmul.mubr.msk.f32.gmra.mxu1 %vm388_vm3, %v564_v12 }
 0x36f   :  { %1895 = vmatprep.mubr.msk.f32.mxu1 %vm388_vm3, %v1187_v43 }
 0x372   :  { %1896 = vmatmul.mubr.msk.f32.vlgmr.msra.gmra.mxu1 %vm388_vm3, %v1189_v44 }
 0x38b   :  { %v1146_v24 = vpop.xlane.xlu1 %1145 }
 0x38c   :  { %2042 = vrcp.f32 %v1146_v24 }
 0x392   :  { %v1149_v31 = vpop.xlane.xlu0 %1148 }
 0x393   :  { %2044 = vrcp.f32 %v1149_v31 }
 0x399   :  { %v2043_v52 = vpop.eup %2042 }
 0x39a   :  { %v1191_v36 = vmul.f32 %v2043_v52, %v2472_v59 }
 0x39c   :  { %1898 = vmatprep.mubr.msk.f32.mxu1 %vm388_vm3, %v1191_v36 }
 0x3a0   :  { %v2045_v23 = vpop.eup %2044 }
 0x3a1   :  { %v1193_v22 = vmul.f32 %v2045_v23, %v2476_v29 }
 0x3a3   :  { %1899 = vmatmul.mubr.msk.f32.gmra.mxu1 %vm388_vm3, %v1193_v22 }
 0x3c4   :  { %v1152_v0 = vpop.xlane.xlu1 %1151 }
 0x3c5   :  { %2046 = vrcp.f32 %v1152_v0 }
 0x3c8   :  { %v1158_v6 = vpop.xlane.xlu1 %1157 }
 0x3c9   :  { %2048 = vrcp.f32 %v1158_v6 }
 0x3ca   :  { %v1155_v40 = vpop.xlane.xlu0 %1154 }
 0x3cb   :  { %2050 = vrcp.f32 %v1155_v40 }
 0x3cc   :  { %v1164_v55 = vpop.xlane.xlu1 %1163 }
 0x3cd   :  { %2052 = vrcp.f32 %v1164_v55 }
 0x3ce   :  { %v1161_v7 = vpop.xlane.xlu0 %1160 }
 0x3cf   :  { %2054 = vrcp.f32 %v1161_v7 }
 0x3d0   :  { %v1170_v11 = vpop.xlane.xlu1 %1169 }
 0x3d1   :  { %2056 = vrcp.f32 %v1170_v11 }
 0x3d2   :  { %v2047_v17 = vpop.eup %2046  ;;  %v1167_v59 = vpop.xlane.xlu0 %1166 }
 0x3d3   :  { %2058 = vrcp.f32 %v1167_v59  ;;  %v1195_v60 = vmul.f32 %v2047_v17, %v2496_v10 }
 0x3d4   :  { %v1176_v29 = vpop.xlane.xlu1 %1175 }
 0x3d5   :  { %1901 = vmatprep.mubr.msk.f32.mxu1 %vm388_vm3, %v1195_v60  ;;  %2060 = vrcp.f32 %v1176_v29 }
 0x3d6   :  { %v1173_v26 = vpop.xlane.xlu0 %1172  ;;  %v2049_v45 = vpop.eup %2048 }
 0x3d7   :  { %2062 = vrcp.f32 %v1173_v26  ;;  %v1199_v38 = vmul.f32 %v2049_v45, %v2509_v32 }
 0x3d8   :  { %v2051_v42 = vpop.eup %2050  ;;  %v1182_v27 = vpop.xlane.xlu1 %1181 }
 0x3d9   :  { %v1197_v46 = vmul.f32 %v2051_v42, %v2517_v2  ;;  %2064 = vrcp.f32 %v1182_v27 }
 0x3da   :  { %v1179_v37 = vpop.xlane.xlu0 %1178  ;;  %v2053_v57 = vpop.eup %2052 }
 0x3db   :  { %2066 = vrcp.f32 %v1179_v37  ;;  %1902 = vmatmul.mubr.msk.f32.gmra.mxu1 %vm388_vm3, %v1197_v46  ;;  %v1203_v62 = vmul.f32 %v2053_v57, %v2520_v8 }
 0x3dc   :  { %v2055_v10 = vpop.eup %2054  ;;  %1904 = vmatprep.mubr.msk.f32.mxu1 %vm388_vm3, %v1199_v38 }
 0x3dd   :  { %v1201_v39 = vmul.f32 %v2055_v10, %v2527_v20  ;;  %v2070_v10 = vld [vmem:[%s2674_s1] sm:$0xff] }
 0x3de   :  { %v1185_v47 = vpop.xlane.xlu0 %1184  ;;  %v2057_v63 = vpop.eup %2056 }
 0x3df   :  { %2068 = vrcp.f32 %v1185_v47  ;;  %1905 = vmatmul.mubr.msk.f32.gmra.mxu1 %vm388_vm3, %v1201_v39  ;;  %v1207_v48 = vmul.f32 %v2057_v63, %v2529_v50  ;;  %v2071_v39 = vld [vmem:[%s2674_s1 + $0x8] sm:$0xff] }
 0x3e0   :  { %v2059_v2 = vpop.eup %2058  ;;  %1907 = vmatprep.mubr.msk.f32.mxu1 %vm388_vm3, %v1203_v62 }
 0x3e1   :  { %v1205_v32 = vmul.f32 %v2059_v2, %v2535_v56 }
 0x3e2   :  { %v2061_v14 = vpop.eup %2060 }
 0x3e3   :  { %1908 = vmatmul.mubr.msk.f32.gmra.mxu1 %vm388_vm3, %v1205_v32  ;;  %v1211_v8 = vmul.f32 %v2061_v14, %v2537_v1 }
 0x3e4   :  { %v2063_v16 = vpop.eup %2062  ;;  %1910 = vmatprep.mubr.msk.f32.mxu1 %vm388_vm3, %v1207_v48 }
 0x3e5   :  { %v1209_v20 = vmul.f32 %v2063_v16, %v2543_v53 }
 0x3e6   :  { %v2065_v34 = vpop.eup %2064 }
 0x3e7   :  { %1911 = vmatmul.mubr.msk.f32.gmra.mxu1 %vm388_vm3, %v1209_v20  ;;  %v1215_v50 = vmul.f32 %v2065_v34, %v2545_v51 }
 0x3e8   :  { %v2067_v15 = vpop.eup %2066  ;;  %1913 = vmatprep.mubr.msk.f32.mxu1 %vm388_vm3, %v1211_v8 }
 0x3e9   :  { %v1213_v56 = vmul.f32 %v2067_v15, %v2552_v28 }
 0x3eb   :  { %1914 = vmatmul.mubr.msk.f32.gmra.mxu1 %vm388_vm3, %v1213_v56 }
 0x3ec   :  { %v2069_v49 = vpop.eup %2068  ;;  %1916 = vmatprep.mubr.msk.f32.mxu1 %vm388_vm3, %v1215_v50 }
 0x3ed   :  { %v1217_v54 = vmul.f32 %v2069_v49, %v2557_v3 }
 0x3ef   :  { %1917 = vmatmul.mubr.msk.f32.gmra.mxu1 %vm388_vm3, %v1217_v54 }
 0x3f3   :  { %v1829_v1 = vpop.f32.mrf.mxu1 }
 0x3f4   :  { %759 = vst.msk [vmem:[#allocation2 + $0x8] sm:$0xff] %vm210_vm2, %v1829_v1 }
 0x3f5   :  { %v679_v53 = vpop.f32.mrf.mxu1 }
 0x3f6   :  { %758 = vst.msk [vmem:[#allocation2] sm:$0xff] %vm210_vm2, %v679_v53 }
 0x3fc   :  { %v1832_v58 = vpop.f32.mrf.mxu1 }
 0x3fd   :  { %761 = vst.msk [vmem:[#allocation2 + $0x18] sm:$0xff] %vm210_vm2, %v1832_v58 }
 0x3fe   :  { %v689_v28 = vpop.f32.mrf.mxu1 }
 0x3ff   :  { %760 = vst.msk [vmem:[#allocation2 + $0x10] sm:$0xff] %vm210_vm2, %v689_v28 }
 0x417   :  { %v1835_v51 = vpop.f32.mrf.mxu1 }
 0x418   :  { %768 = vrot.lane.b32.xlu0 %v1835_v51, %s2079_s13 }
 0x419   :  { %v699_v9 = vpop.f32.mrf.mxu1 }
 0x41b   :  { %v1838_v21 = vpop.f32.mrf.mxu1 }
 0x41c   :  { %766 = vrot.lane.b32.xlu0 %v699_v9, %s2079_s13  ;;  %772 = vrot.lane.b32.xlu1 %v1838_v21, %s2079_s13 }
 0x41d   :  { %v709_v3 = vpop.f32.mrf.mxu1 }
 0x41f   :  { %v1841_v33 = vpop.f32.mrf.mxu1 }
 0x420   :  { %770 = vrot.lane.b32.xlu1 %v709_v3, %s2079_s13  ;;  %v2072_v3 = vld [vmem:[%s2673_s0 + $0x10] sm:$0xff] }
 0x421   :  { %v719_v61 = vpop.f32.mrf.mxu1 }
 0x422   :  { %787 = vrot.lane.b32.xlu0 %v719_v61, %s2080_s14 }
 0x423   :  { %v1844_v41 = vpop.f32.mrf.mxu1 }
 0x424   :  { %789 = vrot.lane.b32.xlu1 %v1841_v33, %s2080_s14 }
 0x425   :  { %v729_v25 = vpop.f32.mrf.mxu1 }
 0x426   :  { %793 = vrot.lane.b32.xlu0 %v1844_v41, %s2080_s14  ;;  %v2073_v41 = vld [vmem:[%s2673_s0] sm:$0xff] }
 0x427   :  { %v1847_v19 = vpop.f32.mrf.mxu1 }
 0x428   :  { %810 = vrot.lane.b32.xlu1 %v1847_v19, %s2081_s15 }
 0x429   :  { %v739_v5 = vpop.f32.mrf.mxu1 }
 0x42a   :  { %791 = vrot.lane.b32.xlu0 %v729_v25, %s2080_s14 }
 0x42c   :  { %808 = vrot.lane.b32.xlu1 %v739_v5, %s2081_s15 }
 0x42e   :  { %v1850_v4 = vpop.f32.mrf.mxu1 }
 0x430   :  { %814 = vrot.lane.b32.xlu1 %v1850_v4, %s2081_s15  ;;  %v749_v30 = vpop.f32.mrf.mxu1 }
 0x432   :  { %v1897_v18 = vpop.f32.mrf.mxu1 }
 0x434   :  { %812 = vrot.lane.b32.xlu1 %v749_v30, %s2081_s15  ;;  %v1356_v35 = vpop.f32.mrf.mxu1 }
 0x435   :  { %1439 = vrot.lane.b32.xlu0 %v1356_v35, %s2078_s12 }
 0x438   :  { %1441 = vrot.lane.b32.xlu1 %v1897_v18, %s2078_s12 }
 0x463   :  { %v1900_v12 = vpop.f32.mrf.mxu1 }
 0x464   :  { %1445 = vrot.lane.b32.xlu1 %v1900_v12, %s2078_s12 }
 0x465   :  { %v1366_v13 = vpop.f32.mrf.mxu1 }
 0x466   :  { %1443 = vrot.lane.b32.xlu0 %v1366_v13, %s2078_s12 }
 0x48a   :  { %v769_v43 = vpop.permute.xlu0 %768 }
 0x48b   :  { %780 = vst.msk [vmem:[#allocation2 + $0x8] sm:$0xff] %vm778_vm4, %v769_v43 }
 0x48e   :  { %v767_v44 = vpop.permute.xlu0 %766  ;;  %v773_v24 = vpop.permute.xlu1 %772 }
 0x48f   :  { %779 = vst.msk [vmem:[#allocation2] sm:$0xff] %vm778_vm4, %v767_v44  ;;  %782 = vst.msk [vmem:[#allocation2 + $0x18] sm:$0xff] %vm778_vm4, %v773_v24 }
 0x492   :  { %v771_v31 = vpop.permute.xlu1 %770 }
 0x493   :  { %781 = vst.msk [vmem:[#allocation2 + $0x10] sm:$0xff] %vm778_vm4, %v771_v31 }
 0x494   :  { %v788_v52 = vpop.permute.xlu0 %787 }
 0x495   :  { %800 = vst.msk [vmem:[#allocation2] sm:$0xff] %vm799_vm5, %v788_v52 }
 0x496   :  { %v790_v36 = vpop.permute.xlu1 %789 }
 0x497   :  { %801 = vst.msk [vmem:[#allocation2 + $0x8] sm:$0xff] %vm799_vm5, %v790_v36 }
 0x498   :  { %v794_v23 = vpop.permute.xlu0 %793 }
 0x499   :  { %803 = vst.msk [vmem:[#allocation2 + $0x18] sm:$0xff] %vm799_vm5, %v794_v23 }
 0x49a   :  { %v811_v22 = vpop.permute.xlu1 %810 }
 0x49b   :  { %822 = vst.msk [vmem:[#allocation2 + $0x8] sm:$0xff] %vm820_vm6, %v811_v22  ;;  %v1903_v0 = vpop.f32.mrf.mxu1 }
 0x49c   :  { %v792_v6 = vpop.permute.xlu0 %791  ;;  %1462 = vrot.lane.b32.xlu0 %v1903_v0, %s2077_s11 }
 0x49d   :  { %802 = vst.msk [vmem:[#allocation2 + $0x10] sm:$0xff] %vm799_vm5, %v792_v6  ;;  %v1376_v40 = vpop.f32.mrf.mxu1 }
 0x49e   :  { %v809_v55 = vpop.permute.xlu1 %808 }
 0x49f   :  { %821 = vst.msk [vmem:[#allocation2] sm:$0xff] %vm820_vm6, %v809_v55  ;;  %v1906_v7 = vpop.f32.mrf.mxu1 }
 0x4a0   :  { %1460 = vrot.lane.b32.xlu0 %v1376_v40, %s2077_s11 }
 0x4a1   :  { %v1386_v11 = vpop.f32.mrf.mxu1 }
 0x4a2   :  { %v815_v17 = vpop.permute.xlu1 %814 }
 0x4a3   :  { %824 = vst.msk [vmem:[#allocation2 + $0x18] sm:$0xff] %vm820_vm6, %v815_v17  ;;  %v1909_v59 = vpop.f32.mrf.mxu1 }
 0x4a4   :  { %1466 = vrot.lane.b32.xlu0 %v1906_v7, %s2077_s11  ;;  %1483 = vrot.lane.b32.xlu1 %v1909_v59, %s2076_s10 }
 0x4a5   :  { %v1396_v60 = vpop.f32.mrf.mxu1 }
 0x4a6   :  { %v813_v29 = vpop.permute.xlu1 %812 }
 0x4a7   :  { %823 = vst.msk [vmem:[#allocation2 + $0x10] sm:$0xff] %vm820_vm6, %v813_v29  ;;  %v1440_v26 = vpop.permute.xlu0 %1439  ;;  %v1912_v45 = vpop.f32.mrf.mxu1 }
 0x4a8   :  { %1452 = vst.msk [vmem:[#allocation2] sm:$0xff] %vm1451_vm7, %v1440_v26  ;;  %1464 = vrot.lane.b32.xlu0 %v1386_v11, %s2077_s11  ;;  %1487 = vrot.lane.b32.xlu1 %v1912_v45, %s2076_s10 }
 0x4a9   :  { %v1406_v42 = vpop.f32.mrf.mxu1 }
 0x4aa   :  { %v1442_v27 = vpop.permute.xlu1 %1441 }
 0x4ab   :  { %1453 = vst.msk [vmem:[#allocation2 + $0x8] sm:$0xff] %vm1451_vm7, %v1442_v27  ;;  %v1915_v46 = vpop.f32.mrf.mxu1 }
 0x4ac   :  { %1485 = vrot.lane.b32.xlu0 %v1406_v42, %s2076_s10  ;;  %1504 = vrot.lane.b32.xlu1 %v1915_v46, %s2075_s9 }
 0x4ad   :  { %v1416_v37 = vpop.f32.mrf.mxu1 }
 0x4af   :  { %v1918_v38 = vpop.f32.mrf.mxu1 }
 0x4b0   :  { %1481 = vrot.lane.b32.xlu0 %v1396_v60, %s2076_s10  ;;  %1508 = vrot.lane.b32.xlu1 %v1918_v38, %s2075_s9 }
 0x4b1   :  { %v1426_v57 = vpop.f32.mrf.mxu1 }
 0x4b4   :  { %1506 = vrot.lane.b32.xlu1 %v1426_v57, %s2075_s9  ;;  %1523 = vrot.lane.b32.xlu0 %v2070_v10, %s2076_s10 }
 0x4b8   :  { %1502 = vrot.lane.b32.xlu1 %v1416_v37, %s2075_s9 }
 0x4bc   :  { %1525 = vrot.lane.b32.xlu1 %v2071_v39, %s2076_s10 }
 0x4d6   :  { %v1446_v47 = vpop.permute.xlu1 %1445 }
 0x4d7   :  { %1455 = vst.msk [vmem:[#allocation2 + $0x18] sm:$0xff] %vm1451_vm7, %v1446_v47 }
 0x4d8   :  { %v1444_v62 = vpop.permute.xlu0 %1443 }
 0x4d9   :  { %1454 = vst.msk [vmem:[#allocation2 + $0x10] sm:$0xff] %vm1451_vm7, %v1444_v62 }
 0x50e   :  { %v1463_v63 = vpop.permute.xlu0 %1462 }
 0x50f   :  { %1474 = vst.msk [vmem:[#allocation2 + $0x8] sm:$0xff] %vm1472_vm8, %v1463_v63 }
 0x512   :  { %v1461_v2 = vpop.permute.xlu0 %1460 }
 0x513   :  { %1473 = vst.msk [vmem:[#allocation2] sm:$0xff] %vm1472_vm8, %v1461_v2 }
 0x516   :  { %v1467_v32 = vpop.permute.xlu0 %1466  ;;  %v1484_v48 = vpop.permute.xlu1 %1483 }
 0x517   :  { %1476 = vst.msk [vmem:[#allocation2 + $0x18] sm:$0xff] %vm1472_vm8, %v1467_v32 }
 0x518   :  { %1495 = vst.msk [vmem:[#allocation2 + $0x8] sm:$0xff] %vm1493_vm9, %v1484_v48 }
 0x51a   :  { %v1465_v14 = vpop.permute.xlu0 %1464  ;;  %v1488_v16 = vpop.permute.xlu1 %1487 }
 0x51b   :  { %1475 = vst.msk [vmem:[#allocation2 + $0x10] sm:$0xff] %vm1472_vm8, %v1465_v14 }
 0x51c   :  { %1497 = vst.msk [vmem:[#allocation2 + $0x18] sm:$0xff] %vm1493_vm9, %v1488_v16 }
 0x51e   :  { %v1486_v20 = vpop.permute.xlu0 %1485  ;;  %v1505_v8 = vpop.permute.xlu1 %1504 }
 0x51f   :  { %1496 = vst.msk [vmem:[#allocation2 + $0x10] sm:$0xff] %vm1493_vm9, %v1486_v20 }
 0x520   :  { %1516 = vst.msk [vmem:[#allocation2 + $0x8] sm:$0xff] %vm1514_vm10, %v1505_v8 }
 0x522   :  { %v1482_v34 = vpop.permute.xlu0 %1481  ;;  %v1509_v15 = vpop.permute.xlu1 %1508 }
 0x523   :  { %1494 = vst.msk [vmem:[#allocation2] sm:$0xff] %vm1493_vm9, %v1482_v34 }
 0x524   :  { %1518 = vst.msk [vmem:[#allocation2 + $0x18] sm:$0xff] %vm1514_vm10, %v1509_v15 }
 0x526   :  { %v1507_v56 = vpop.permute.xlu1 %1506  ;;  %v1524_v50 = vpop.permute.xlu0 %1523 }
 0x527   :  { %1517 = vst.msk [vmem:[#allocation2 + $0x10] sm:$0xff] %vm1514_vm10, %v1507_v56  ;;  %1927 = vmatprep.mubr.msk.f32.mxu0 %vm1527_vm11, %v1524_v50  ;;  %v1520_v53 = vld [vmem:[#allocation2 + $0x8] sm:$0xff] }
 0x52a   :  { %v1503_v49 = vpop.permute.xlu1 %1502 }
 0x52b   :  { %v1522_v54 = vld [vmem:[#allocation2 + $0x18] sm:$0xff]  ;;  %1515 = vst.msk [vmem:[#allocation2] sm:$0xff] %vm1514_vm10, %v1503_v49 }
 0x52c   :  { %1919 = vmatprep.subr.mxu0 %v1522_v54 }
 0x52d   :  { %1920 = vmatpush3.msra.mxu0 %v1522_v54 }
 0x52e   :  { %v1521_v1 = vld [vmem:[#allocation2 + $0x10] sm:$0xff]  ;;  %v1526_v28 = vpop.permute.xlu1 %1525 }
 0x52f   :  { %1921 = vmatprep.subr.mxu0 %v1521_v1 }
 0x530   :  { %1922 = vmatpush3.msra.mxu0 %v1521_v1 }
 0x531   :  { %1923 = vmatprep.subr.mxu0 %v1520_v53 }
 0x532   :  { %1924 = vmatpush3.msra.mxu0 %v1520_v53  ;;  %v1519_v58 = vld [vmem:[#allocation2] sm:$0xff] }
 0x533   :  { %1925 = vmatprep.subr.mxu0 %v1519_v58 }
 0x534   :  { %1926 = vmatpush3.msra.mxu0 %v1519_v58 }
 0x535   :  { %1928 = vmatmul.mubr.msk.f32.vlgmr.msra.gmra.mxu0 %vm1527_vm11, %v1526_v28 }
 0x5f5   :  { %v1929_v51 = vpop.f32.mrf.mxu0 }
 0x5f6   :  { %v1608_v9 = vmul.f32 1e-05, %v1929_v51 }
 0x5f7   :  { %v1598_v21 = vpop.f32.mrf.mxu0 }
 0x5f8   :  { %v1610_v33 = vadd.f32 %v2072_v3, %v1608_v9  ;;  %v1607_v61 = vmul.f32 1e-05, %v1598_v21 }
 0x5fa   :  { %1612 = vst [vmem:[%s2675_s2 + $0x8] sm:$0xff] %v1610_v33  ;;  %v1609_v25 = vadd.f32 %v2073_v41, %v1607_v61 }
 0x5fc   :  { %1611 = vst [vmem:[%s2675_s2] sm:$0xff] %v1609_v25 }

</bundles_post_ra>
